<compile_context>
chip_gen: v7x
topology: tpu7x:2x2x1
jax: 0.10.0
libtpu: 0.0.40
codegen_flags: <defaults>
</compile_context>

<pallas_src>
import jax
import jax.numpy as jnp
from jax.experimental import pallas as pl
from jax.experimental.pallas import tpu as pltpu

HIDDEN = 32               # hidden width of each branch
TWOH = 2 * HIDDEN         # fused x+y branch width (sublanes)
TL_MAX = 4096             # max lanes (batch rows) per grid step (sweepable 2048-8192)
MIN_GRID = 4              # keep >= 2 pipelined steps per TensorCore on megacore parts

_HI = jax.lax.Precision.HIGHEST


def double_vae_kernel(inp_ref, w1p_ref, wenc_ref, bias_ref, w4p_ref, wdec_ref, out_ref):
    """One grid step: TL batch elements, both x/y branches, all five Linears.

    inp_ref  : (8, TL)  VMEM  rows [x, y, eps_x, eps_y, 1, 0, 0, 0]
    w1p_ref  : (64, 8)  VMEM  encoder Linear(1,32) packed; cols follow inp rows,
                              col 4 carries b1.  Rows 0:32 = x branch, 32:64 = y.
    wenc_ref : (8, 64)  VMEM  encoder Linear(32,1) heads (+ ytp row); cols = h2 rows
    bias_ref : (8, 1)   VMEM  [xb31, yb31, xb6, yb6, xb32, yb32, l1w*xb31+l1b, 0]
    w4p_ref  : (64, 8)  VMEM  decoder Linear(1,32) packed; cols follow z8 rows,
                              col 2 carries b4.
    wdec_ref : (8, 64)  VMEM  decoder Linear(32,1) heads; cols = h4 rows
    out_ref  : (8, TL)  VMEM  rows [x_trans, y_trans, x_pred, y_pred,
                                    x_logvar, y_logvar, ytp, 0]
    """
    inp = inp_ref[...]                                               # (8, TL)

    # ---- fused encoder: both branches' Linear(1,32) (+ b1) in one MXU matmul.
    h2 = jnp.tanh(jnp.dot(w1p_ref[...], inp,
                          preferred_element_type=jnp.float32, precision=_HI))   # (64, TL)

    # ---- both Linear(32,1) encoder heads + the final Linear(1,1) ytp row.
    enc = jnp.dot(wenc_ref[...], h2,
                  preferred_element_type=jnp.float32, precision=_HI) + bias_ref[...]
    # enc rows: [x_trans, y_trans, xb6, yb6, x_logvar, y_logvar, ytp, 0]     # (8, TL)

    # ---- reparameterize, batched on a (2, TL) slab (eps precomputed outside).
    mu2 = enc[0:2, :]
    lv2 = enc[4:6, :]
    eps2 = inp[2:4, :]
    z2 = mu2 + eps2 * jnp.exp(0.5 * lv2)                             # (2, TL) = [x_z, y_z]

    # ---- decoder input slab rows [x_z, y_z, 1, 0, 0, 0, 0, 0] (the 1 folds b4 in).
    row8 = jax.lax.broadcasted_iota(jnp.int32, (8, 1), 0)
    z8 = jnp.where(row8 == 0, z2[0:1, :],
         jnp.where(row8 == 1, z2[1:2, :],
         jnp.where(row8 == 2, 1.0, 0.0)))                            # (8, TL)

    # ---- fused decoder: Linear(1,32) (+ b4) + tanh, then Linear(32,1) heads.
    h4 = jnp.tanh(jnp.dot(w4p_ref[...], z8,
                          preferred_element_type=jnp.float32, precision=_HI))   # (64, TL)

    # Wdec only populates rows 2/3 (x_pred / y_pred); enc already carries every other
    # output row (incl. xb6/yb6 seeds for rows 2/3), so one add + one full-tile
    # unmasked store finishes the step.
    out_ref[...] = enc + jnp.dot(wdec_ref[...], h4,
                                 preferred_element_type=jnp.float32, precision=_HI)


def pack_params(p):
    """Pack the 22 tiny PyTorch-style params into 5 MXU-ready slabs."""
    f32 = jnp.float32
    z32 = jnp.zeros((HIDDEN,), f32)
    z64 = jnp.zeros((TWOH,), f32)

    def cat(xv, yv):
        return jnp.concatenate([jnp.asarray(xv, f32).reshape(-1),
                                jnp.asarray(yv, f32).reshape(-1)])   # (64,)

    # Encoder Linear(1,32): columns follow input-slab rows [x, y, eps_x, eps_y, 1, 0,0,0]
    w1p = jnp.stack(
        [cat(p["xw1"], z32), cat(z32, p["yw1"]), z64, z64,
         cat(p["xb1"], p["yb1"]), z64, z64, z64], axis=1)            # (64, 8)

    # Decoder Linear(1,32): columns follow z8 rows [x_z, y_z, 1, 0, ...]
    w4p = jnp.stack(
        [cat(p["xw4"], z32), cat(z32, p["yw4"]),
         cat(p["xb4"], p["yb4"]), z64, z64, z64, z64, z64], axis=1)  # (64, 8)

    # Encoder Linear(32,1) heads; rows follow the output-slab row order.
    wenc = jnp.stack(
        [cat(p["xw31"], z32),              # x_trans
         cat(z32, p["yw31"]),              # y_trans
         z64, z64,                         # x_pred / y_pred come from the decoder
         cat(p["xw32"], z32),              # x_logvar
         cat(z32, p["yw32"]),              # y_logvar
         cat(p["l1w"] * p["xw31"], z32),   # ytp = l1w * x_trans + l1b
         z64], axis=0)                     # (8, 64)

    wdec = jnp.stack(
        [z64, z64,
         cat(p["xw6"], z32),               # x_pred
         cat(z32, p["yw6"]),               # y_pred
         z64, z64, z64, z64], axis=0)      # (8, 64)

    bias = jnp.stack(
        [p["xb31"], p["yb31"], p["xb6"], p["yb6"],
         p["xb32"], p["yb32"], p["l1w"] * p["xb31"] + p["l1b"],
         jnp.zeros((), f32)]).astype(f32).reshape(8, 1)              # (8, 1)

    return w1p, wenc, bias, w4p, wdec


def _pick_tile(n):
    """Lanes per grid step: large to amortize the ~600-cycle per-step cost, but keep
    the grid >= MIN_GRID so v7x's two TensorCores each get a pipelined loop."""
    tl = max(128, min(TL_MAX, pl.cdiv(n, MIN_GRID)))
    return int(pl.cdiv(tl, 128) * 128)


def double_vae_forward(xy, eps, params, tl=None):
    N = xy.shape[0]
    if tl is None:
        tl = _pick_tile(N)
    assert tl % 128 == 0, "lane tile must be a multiple of 128"

    w1p, wenc, bias, w4p, wdec = pack_params(params)

    # Batch on the lane axis: one (8, N) input slab
    # rows = [x, y, eps_x, eps_y, 1 (bias feed), 0, 0, 0].
    inp = jnp.concatenate(
        [xy.T.astype(jnp.float32), eps.T.astype(jnp.float32),
         jnp.ones((1, N), jnp.float32), jnp.zeros((3, N), jnp.float32)], axis=0)

    n_pad = pl.cdiv(N, tl) * tl
    if n_pad != N:
        inp = jnp.pad(inp, ((0, 0), (0, n_pad - N)))

    grid = (n_pad // tl,)

    out = pl.pallas_call(
        double_vae_kernel,
        out_shape=jax.ShapeDtypeStruct((8, n_pad), jnp.float32),
        grid_spec=pltpu.PrefetchScalarGridSpec(
            num_scalar_prefetch=0,
            grid=grid,
            in_specs=[
                pl.BlockSpec((8, tl), lambda i: (0, i)),        # input slab (streamed)
                pl.BlockSpec((TWOH, 8), lambda i: (0, 0)),      # W1pack (resident)
                pl.BlockSpec((8, TWOH), lambda i: (0, 0)),      # Wenc   (resident)
                pl.BlockSpec((8, 1), lambda i: (0, 0)),         # biases (resident)
                pl.BlockSpec((TWOH, 8), lambda i: (0, 0)),      # W4pack (resident)
                pl.BlockSpec((8, TWOH), lambda i: (0, 0)),      # Wdec   (resident)
            ],
            out_specs=pl.BlockSpec((8, tl), lambda i: (0, i)),
        ),
        compiler_params=pltpu.CompilerParams(
            dimension_semantics=("parallel",),                  # megacore split on v7x
            vmem_limit_bytes=32 * 1024 * 1024,                  # headroom vs v5e 16MiB default
        ),
    )(inp, w1p, wenc, bias, w4p, wdec)

    out = out[:, :N]
    x_trans = out[0:1, :].T
    y_trans = out[1:2, :].T
    pred = out[2:4, :].T            # (N, 2) = cat(x_pred, y_pred)
    x_logvar = out[4:5, :].T
    y_logvar = out[5:6, :].T
    ytp = out[6:7, :].T
    return (x_trans, y_trans, pred, x_logvar, y_logvar), ytp


def reference_forward(xy, eps, p):
    """Pure-JAX reference matching the PyTorch forward semantics."""
    x = xy[:, 0:1]
    y = xy[:, 1:2]
    eps_x = eps[:, 0:1]
    eps_y = eps[:, 1:2]

    h2x = jnp.tanh(x * p["xw1"][None, :] + p["xb1"][None, :])
    x_trans = jnp.sum(h2x * p["xw31"][None, :], axis=-1, keepdims=True) + p["xb31"]
    x_logvar = jnp.sum(h2x * p["xw32"][None, :], axis=-1, keepdims=True) + p["xb32"]
    x_z = x_trans + eps_x * jnp.exp(0.5 * x_logvar)
    h4x = jnp.tanh(x_z * p["xw4"][None, :] + p["xb4"][None, :])
    x_pred = jnp.sum(h4x * p["xw6"][None, :], axis=-1, keepdims=True) + p["xb6"]

    h2y = jnp.tanh(y * p["yw1"][None, :] + p["yb1"][None, :])
    y_trans = jnp.sum(h2y * p["yw31"][None, :], axis=-1, keepdims=True) + p["yb31"]
    y_logvar = jnp.sum(h2y * p["yw32"][None, :], axis=-1, keepdims=True) + p["yb32"]
    y_z = y_trans + eps_y * jnp.exp(0.5 * y_logvar)
    h4y = jnp.tanh(y_z * p["yw4"][None, :] + p["yb4"][None, :])
    y_pred = jnp.sum(h4y * p["yw6"][None, :], axis=-1, keepdims=True) + p["yb6"]

    pred = jnp.concatenate([x_pred, y_pred], axis=1)
    ytp = x_trans * p["l1w"] + p["l1b"]
    return (x_trans, y_trans, pred, x_logvar, y_logvar, ytp)


if __name__ == "__main__":
    key = jax.random.PRNGKey(0)
    N = 1024                       # batch of (x, y) pairs; adaptive tile -> grid of 4

    keys = iter(jax.random.split(key, 64))

    def nrm(shape, std):
        return (std * jax.random.normal(next(keys), shape)).astype(jnp.float32)

    xav = (2.0 / (1 + HIDDEN)) ** 0.5       # xavier_normal_ std for Linear(1, 32)
    small = 1.0 / (HIDDEN ** 0.5)           # default-ish scale for 32->1 layers

    params = {}
    for pre in ("x", "y"):
        params[pre + "w1"] = nrm((HIDDEN,), xav)
        params[pre + "b1"] = nrm((HIDDEN,), 0.1)
        params[pre + "w31"] = nrm((HIDDEN,), small)
        params[pre + "b31"] = nrm((), 0.1)
        params[pre + "w32"] = nrm((HIDDEN,), small)
        params[pre + "b32"] = nrm((), 0.1)
        params[pre + "w4"] = nrm((HIDDEN,), xav)
        params[pre + "b4"] = nrm((HIDDEN,), 0.1)
        params[pre + "w6"] = nrm((HIDDEN,), small)
        params[pre + "b6"] = nrm((), 0.1)
    params["l1w"] = nrm((), 1.0)
    params["l1b"] = nrm((), 0.1)

    xy = jax.random.normal(next(keys), (N, 2), dtype=jnp.float32)
    # TODO(synk): torch.randn_like is replaced by externally supplied eps ~ N(0,1).
    eps = jax.random.normal(next(keys), (N, 2), dtype=jnp.float32)

    (x_trans, y_trans, pred, x_logvar, y_logvar), ytp = double_vae_forward(xy, eps, params)
    outs = jax.block_until_ready((x_trans, y_trans, pred, x_logvar, y_logvar, ytp))

    refs = reference_forward(xy, eps, params)
    # HIGHEST-precision MXU matmuls are ~1e-6-accurate; 1e-4 leaves margin while still
    # catching any real packing / row-mapping bug (which would be O(0.1-1)).
    for got, want in zip(outs, refs):
        assert got.shape == want.shape, (got.shape, want.shape)
        assert jnp.allclose(got, want, rtol=1e-4, atol=1e-4), "mismatch vs reference"

    print("KERNEL_OK")
</pallas_src>

<mosaic_0001>
module attributes {stable_mosaic.version = 11 : i64} {
  func.func @double_vae_kernel(%arg0: i32, %arg1: memref<8x256xf32, #tpu.memory_space<vmem>>, %arg2: memref<64x8xf32, #tpu.memory_space<vmem>>, %arg3: memref<8x64xf32, #tpu.memory_space<vmem>>, %arg4: memref<8x1xf32, #tpu.memory_space<vmem>>, %arg5: memref<64x8xf32, #tpu.memory_space<vmem>>, %arg6: memref<8x64xf32, #tpu.memory_space<vmem>>, %arg7: memref<8x256xf32, #tpu.memory_space<vmem>>) attributes {dimension_semantics = [#tpu.dimension_semantics<parallel>], iteration_bounds = array<i64: 4>, scalar_prefetch = 0 : i64, scratch_operands = 0 : i64, tpu.core_type = #tpu.core_type<tc>, window_params = [{transform_indices = @transform_0, window_bounds = array<i64: 8, 256>}, {pipeline_mode = #tpu.pipeline_mode<synchronous>, transform_indices = @transform_1, window_bounds = array<i64: 64, 8>}, {pipeline_mode = #tpu.pipeline_mode<synchronous>, transform_indices = @transform_2, window_bounds = array<i64: 8, 64>}, {pipeline_mode = #tpu.pipeline_mode<synchronous>, transform_indices = @transform_3, window_bounds = array<i64: 8, 1>}, {pipeline_mode = #tpu.pipeline_mode<synchronous>, transform_indices = @transform_4, window_bounds = array<i64: 64, 8>}, {pipeline_mode = #tpu.pipeline_mode<synchronous>, transform_indices = @transform_5, window_bounds = array<i64: 8, 64>}, {transform_indices = @transform_6, window_bounds = array<i64: 8, 256>}]} {
    %c0 = arith.constant 0 : index
    %c0_0 = arith.constant 0 : index
    %0 = vector.load %arg1[%c0, %c0_0] : memref<8x256xf32, #tpu.memory_space<vmem>>, vector<8x256xf32>
    %c0_1 = arith.constant 0 : index
    %c0_2 = arith.constant 0 : index
    %1 = vector.load %arg2[%c0_1, %c0_2] : memref<64x8xf32, #tpu.memory_space<vmem>>, vector<64x8xf32>
    %cst = arith.constant dense<0.000000e+00> : vector<64x256xf32>
    %2 = tpu.matmul %1, %0, %cst {dimension_numbers = #tpu.dot_dimension_numbers<[1], [0], [0], [1], [0, 0, 1, 1], [], []>, precision = #tpu.contract_precision<fp32>} : vector<64x8xf32>, vector<8x256xf32>, vector<64x256xf32> -> vector<64x256xf32>
    %3 = math.tanh %2 : vector<64x256xf32>
    %c0_3 = arith.constant 0 : index
    %c0_4 = arith.constant 0 : index
    %4 = vector.load %arg3[%c0_3, %c0_4] : memref<8x64xf32, #tpu.memory_space<vmem>>, vector<8x64xf32>
    %cst_5 = arith.constant dense<0.000000e+00> : vector<8x256xf32>
    %5 = tpu.matmul %4, %3, %cst_5 {dimension_numbers = #tpu.dot_dimension_numbers<[1], [0], [0], [1], [0, 0, 1, 1], [], []>, precision = #tpu.contract_precision<fp32>} : vector<8x64xf32>, vector<64x256xf32>, vector<8x256xf32> -> vector<8x256xf32>
    %c0_6 = arith.constant 0 : index
    %c0_7 = arith.constant 0 : index
    %6 = vector.load %arg4[%c0_6, %c0_7] : memref<8x1xf32, #tpu.memory_space<vmem>>, vector<8x1xf32>
    %7 = vector.broadcast %6 : vector<8x1xf32> to vector<8x256xf32>
    %8 = arith.addf %5, %7 : vector<8x256xf32>
    %9 = vector.extract_strided_slice %8 {offsets = [0, 0], sizes = [2, 256], strides = [1, 1]} : vector<8x256xf32> to vector<2x256xf32>
    %10 = vector.extract_strided_slice %8 {offsets = [4, 0], sizes = [2, 256], strides = [1, 1]} : vector<8x256xf32> to vector<2x256xf32>
    %11 = vector.extract_strided_slice %0 {offsets = [2, 0], sizes = [2, 256], strides = [1, 1]} : vector<8x256xf32> to vector<2x256xf32>
    %cst_8 = arith.constant 5.000000e-01 : f32
    %12 = vector.broadcast %cst_8 : f32 to vector<2x256xf32>
    %13 = arith.mulf %12, %10 : vector<2x256xf32>
    %14 = math.exp %13 : vector<2x256xf32>
    %15 = arith.mulf %11, %14 : vector<2x256xf32>
    %16 = arith.addf %9, %15 : vector<2x256xf32>
    %17 = tpu.iota {dimensions = array<i32: 0>} : vector<8x1xi32>
    %c0_i32 = arith.constant 0 : i32
    %18 = vector.broadcast %c0_i32 : i32 to vector<8x1xi32>
    %19 = arith.cmpi eq, %17, %18 : vector<8x1xi32>
    %20 = vector.extract_strided_slice %16 {offsets = [0, 0], sizes = [1, 256], strides = [1, 1]} : vector<2x256xf32> to vector<1x256xf32>
    %c1_i32 = arith.constant 1 : i32
    %21 = vector.broadcast %c1_i32 : i32 to vector<8x1xi32>
    %22 = arith.cmpi eq, %17, %21 : vector<8x1xi32>
    %23 = vector.extract_strided_slice %16 {offsets = [1, 0], sizes = [1, 256], strides = [1, 1]} : vector<2x256xf32> to vector<1x256xf32>
    %c2_i32 = arith.constant 2 : i32
    %24 = vector.broadcast %c2_i32 : i32 to vector<8x1xi32>
    %25 = arith.cmpi eq, %17, %24 : vector<8x1xi32>
    %cst_9 = arith.constant 1.000000e+00 : f32
    %cst_10 = arith.constant 0.000000e+00 : f32
    %26 = vector.broadcast %cst_9 : f32 to vector<8x1xf32>
    %27 = vector.broadcast %cst_10 : f32 to vector<8x1xf32>
    %28 = arith.select %25, %26, %27 : vector<8x1xi1>, vector<8x1xf32>
    %29 = vector.shape_cast %22 : vector<8x1xi1> to vector<8x1xi1>
    %30 = vector.broadcast %29 : vector<8x1xi1> to vector<8x256xi1>
    %31 = vector.shape_cast %23 : vector<1x256xf32> to vector<1x256xf32>
    %32 = vector.broadcast %31 : vector<1x256xf32> to vector<8x256xf32>
    %33 = vector.shape_cast %28 : vector<8x1xf32> to vector<8x1xf32>
    %34 = vector.broadcast %33 : vector<8x1xf32> to vector<8x256xf32>
    %35 = arith.select %30, %32, %34 : vector<8x256xi1>, vector<8x256xf32>
    %36 = vector.shape_cast %19 : vector<8x1xi1> to vector<8x1xi1>
    %37 = vector.broadcast %36 : vector<8x1xi1> to vector<8x256xi1>
    %38 = vector.shape_cast %20 : vector<1x256xf32> to vector<1x256xf32>
    %39 = vector.broadcast %38 : vector<1x256xf32> to vector<8x256xf32>
    %40 = arith.select %37, %39, %35 : vector<8x256xi1>, vector<8x256xf32>
    %c0_11 = arith.constant 0 : index
    %c0_12 = arith.constant 0 : index
    %41 = vector.load %arg5[%c0_11, %c0_12] : memref<64x8xf32, #tpu.memory_space<vmem>>, vector<64x8xf32>
    %cst_13 = arith.constant dense<0.000000e+00> : vector<64x256xf32>
    %42 = tpu.matmul %41, %40, %cst_13 {dimension_numbers = #tpu.dot_dimension_numbers<[1], [0], [0], [1], [0, 0, 1, 1], [], []>, precision = #tpu.contract_precision<fp32>} : vector<64x8xf32>, vector<8x256xf32>, vector<64x256xf32> -> vector<64x256xf32>
    %43 = math.tanh %42 : vector<64x256xf32>
    %c0_14 = arith.constant 0 : index
    %c0_15 = arith.constant 0 : index
    %44 = vector.load %arg6[%c0_14, %c0_15] : memref<8x64xf32, #tpu.memory_space<vmem>>, vector<8x64xf32>
    %cst_16 = arith.constant dense<0.000000e+00> : vector<8x256xf32>
    %45 = tpu.matmul %44, %43, %cst_16 {dimension_numbers = #tpu.dot_dimension_numbers<[1], [0], [0], [1], [0, 0, 1, 1], [], []>, precision = #tpu.contract_precision<fp32>} : vector<8x64xf32>, vector<64x256xf32>, vector<8x256xf32> -> vector<8x256xf32>
    %46 = arith.addf %8, %45 : vector<8x256xf32>
    %c0_17 = arith.constant 0 : index
    %c0_18 = arith.constant 0 : index
    %47 = vector.load %arg7[%c0_17, %c0_18] : memref<8x256xf32, #tpu.memory_space<vmem>>, vector<8x256xf32>
    tpu.vector_store %arg7[%c0_17, %c0_18], %46 {strides = array<i32>} : memref<8x256xf32, #tpu.memory_space<vmem>>, vector<8x256xf32>,
    return
  }
  func.func @transform_0(%arg0: i32) -> (i32, i32) {
    %c0_i32 = arith.constant 0 : i32
    %c0_i32_0 = arith.constant 0 : i32
    return %c0_i32, %arg0 : i32, i32
  }
  func.func @transform_1(%arg0: i32) -> (i32, i32) {
    %c0_i32 = arith.constant 0 : i32
    %c0_i32_0 = arith.constant 0 : i32
    %c0_i32_1 = arith.constant 0 : i32
    return %c0_i32, %c0_i32_0 : i32, i32
  }
  func.func @transform_2(%arg0: i32) -> (i32, i32) {
    %c0_i32 = arith.constant 0 : i32
    %c0_i32_0 = arith.constant 0 : i32
    %c0_i32_1 = arith.constant 0 : i32
    return %c0_i32, %c0_i32_0 : i32, i32
  }
  func.func @transform_3(%arg0: i32) -> (i32, i32) {
    %c0_i32 = arith.constant 0 : i32
    %c0_i32_0 = arith.constant 0 : i32
    %c0_i32_1 = arith.constant 0 : i32
    return %c0_i32, %c0_i32_0 : i32, i32
  }
  func.func @transform_4(%arg0: i32) -> (i32, i32) {
    %c0_i32 = arith.constant 0 : i32
    %c0_i32_0 = arith.constant 0 : i32
    %c0_i32_1 = arith.constant 0 : i32
    return %c0_i32, %c0_i32_0 : i32, i32
  }
  func.func @transform_5(%arg0: i32) -> (i32, i32) {
    %c0_i32 = arith.constant 0 : i32
    %c0_i32_0 = arith.constant 0 : i32
    %c0_i32_1 = arith.constant 0 : i32
    return %c0_i32, %c0_i32_0 : i32, i32
  }
  func.func @transform_6(%arg0: i32) -> (i32, i32) {
    %c0_i32 = arith.constant 0 : i32
    %c0_i32_0 = arith.constant 0 : i32
    return %c0_i32, %arg0 : i32, i32
  }
}

</mosaic_0001>

<bundles_post_ra>
// kernel: tpu_custom_call.1
= control target key start
LH: loop header
LB: loop body
LE: loop exit
PB: predicated region body
PF: predicated region fallthrough
CT: control target
= control target key end

     0   :  { %11 = vsyncpa [#allocation3], 0  ;;  %s4917_s0 = inlined_call_operand.vmem [shape: f32[8,1024], index: 0, kind: input, shape index: {}]   ;;  %s4918_s1 = inlined_call_operand.vmem [shape: f32[64,8], index: 1, kind: input, shape index: {}]   ;;  %s4919_s2 = inlined_call_operand.vmem [shape: f32[8,64], index: 2, kind: input, shape index: {}]   ;;  %s4920_s3 = inlined_call_operand.vmem [shape: f32[8,1], index: 3, kind: input, shape index: {}]   ;;  %s4921_s4 = inlined_call_operand.vmem [shape: f32[64,8], index: 4, kind: input, shape index: {}]   ;;  %s4922_s5 = inlined_call_operand.vmem [shape: f32[8,64], index: 5, kind: input, shape index: {}]   ;;  %s4923_s6 = inlined_call_operand.hbm [shape: f32[8,1024], index: 6, kind: output, shape index: {}]  }
   0x1   :  { %13 = vsyncpa [#allocation3 + $0x1], 0  ;;  %s4006_s21 = smov 0   ;;  %s4008_s22 = smov 0  }
   0x2   :  { %s4010_s23 = smov 0   ;;  %s4012_s24 = smov 0  }
   0x3 LB: > { %s4027_s25 = sadd.s32 4294967295, %s3966_s24   ;;  %s3407_s26 = sadd.s32 4294967294, %s3966_s24   ;;  %s3966_s24 = sphi %s4012_s24, %s4939_s24   ;;  %s3962_s23 = sphi %s4010_s23, %s4938_s23   ;;  %s3958_s22 = sphi %s4008_s22, %s4937_s22   ;;  %s3954_s21 = sphi %s4006_s21, %s4936_s21  }
   0x4   : > { %s4031_s27 = sadd.s32 1, %s3966_s24   ;;  %s157_s28 = sadd.s32 1, %s3962_s23 }
   0x5   : > { %s154_s29 = ssub.s32 %s3966_s24, %s4031_s27  ;;  %p167_p0 = scmp.ne.s32.totalorder %s3962_s23, %s3958_s22 }
   0x6   : > { %p155_p1 = scmp.eq.s32.totalorder %s154_s29, 0  ;;  %p168_p2 = scmp.eq.s32.totalorder %s4027_s25, 3 }
   0x7   : > { %p173_p3 = scmp.ne.s32.totalorder %s3958_s22, %s3954_s21  ;;  %p174_p4 = scmp.eq.s32.totalorder %s3407_s26, 3 }
   0x8   : > { %s4042_s30 = scalar_select %p155_p1, %s3962_s23, %s157_s28  }
   0x9   : > { %p4044_p5 = por %p168_p2, %p167_p0  ;;  %p4048_p6 = por %p174_p4, %p173_p3 }
   0xa   : > { %p3410_p7 = scmp.ge.s32.totalorder %s3966_s24, 1  ;;  %p216_p8 = scmp.lt.s32.totalorder %s3966_s24, 5 }
   0xc   : > { %p217_p9 = pnand %p3410_p7, %p216_p8 }
   0xd   : > { %s3412_s9 = sshll.u32 (!%p217_p9), %s4027_s25, 1  ;;  %v255_v0 = vld [vmem:[%s4918_s1] sm:$0xff] (!%p217_p9)  ;;  %vm263_vm0 = vcmask (!%p217_p9), 64512   ;;  %v256_v1 = vld [vmem:[%s4918_s1 + $0x8] sm:$0xff] (!%p217_p9)  ;;  %v257_v2 = vld [vmem:[%s4918_s1 + $0x10] sm:$0xff] (!%p217_p9)  ;;  %v3968_v3 = vmov (!%p217_p9), 0.0  }
   0xe   : > { %220 = sbr.rel (%p217_p9) target bundleno = 1504 (0x5e0), region = 44  ;;  %p247_p10 = scmp.lt.s32.totalorder (!%p217_p9), %s3412_s9, 7  ;;  %354 = vmatprep.mubr.f32.mxu0 (!%p217_p9), %v3968_v3  ;;  %v265_v4 = vsel (!%p217_p9), %vm263_vm0, %v255_v0, 0  ;;  %v268_v5 = vsel (!%p217_p9), %vm263_vm0, %v256_v1, 0  ;;  %v271_v6 = vsel (!%p217_p9), %vm263_vm0, %v257_v2, 0  ;;  %v258_v7 = vld [vmem:[%s4918_s1 + $0x18] sm:$0xff] (!%p217_p9)  ;;  %1203 = vmatprep.mubr.f32.mxu1 (!%p217_p9), %v3968_v3 }
   0xf   : > { %v259_v8 = vld [vmem:[%s4918_s1 + $0x20] sm:$0xff] (!%p217_p9)  ;;  %v4075_v9 = vand.u32 (!%p217_p9), 4294901760, %v265_v4  ;;  %v4077_v10 = vand.u32 (!%p217_p9), 4294901760, %v268_v5  ;;  %v4079_v11 = vand.u32 (!%p217_p9), 4294901760, %v271_v6  ;;  %v274_v12 = vsel (!%p217_p9), %vm263_vm0, %v258_v7, 0  ;;  %v260_v18 = vld [vmem:[%s4918_s1 + $0x28] sm:$0xff] (!%p217_p9) }
  0x10   : > { %v4082_v13 = vand.u32 (!%p217_p9), 4294901760, %v274_v12  ;;  %v277_v17 = vsel (!%p217_p9), %vm263_vm0, %v259_v8, 0  ;;  %v280_v26 = vsel (!%p217_p9), %vm263_vm0, %v260_v18, 0  ;;  %v261_v31 = vld [vmem:[%s4918_s1 + $0x30] sm:$0xff] (!%p217_p9)  ;;  %v262_v45 = vld [vmem:[%s4918_s1 + $0x38] sm:$0xff] (!%p217_p9)  ;;  %v1113_v8 = vld [vmem:[%s4920_s3] sm:$0xff] (!%p217_p9) }
  0x11   : > { %v4085_v14 = vsub.f32 (!%p217_p9), %v265_v4, %v4075_v9  ;;  %v4088_v15 = vsub.f32 (!%p217_p9), %v268_v5, %v4077_v10  ;;  %v4091_v16 = vsub.f32 (!%p217_p9), %v271_v6, %v4079_v11  ;;  %v4110_v25 = vand.u32 (!%p217_p9), 4294901760, %v277_v17  ;;  %s3419_s10 = sshll.u32 (!%p217_p9), %s4027_s25, 8  ;;  %s3970_s16 = smov (!%p217_p9), [#allocation2]  }
  0x12   : > { %v4108_v24 = vsub.f32 (!%p217_p9), %v274_v12, %v4082_v13  ;;  %v4142_v37 = vand.u32 (!%p217_p9), 4294901760, %v280_v26  ;;  %v283_v38 = vsel (!%p217_p9), %vm263_vm0, %v261_v31, 0  ;;  %v286_v53 = vsel (!%p217_p9), %vm263_vm0, %v262_v45, 0  ;;  %s4875_s14 = scalar_lea.hbm (!%p217_p9), %s4923_s6, %s3419_s10  ;;  %s3908_s17 = sshll.u32 (!%p217_p9), %s3970_s16, 4  ;;  %s3909_s17 = int_to_ptr.vmem [resolvable:$false] %s3908_s17 }
  0x13   : > { %v357_v19 = vand.u32 (!%p217_p9), 4294901760, %v4085_v14  ;;  %v368_v20 = vand.u32 (!%p217_p9), 4294901760, %v4088_v15  ;;  %v379_v23 = vand.u32 (!%p217_p9), 4294901760, %v4091_v16  ;;  %v4140_v36 = vsub.f32 (!%p217_p9), %v277_v17, %v4110_v25  ;;  %s3910_s18 = scalar_lea.vmem (!%p217_p9), %s3909_s17, 512 }
  0x14   : > { %v390_v35 = vand.u32 (!%p217_p9), 4294901760, %v4108_v24  ;;  %v4164_v47 = vsub.f32 (!%p217_p9), %v280_v26, %v4142_v37  ;;  %v4166_v48 = vand.u32 (!%p217_p9), 4294901760, %v283_v38  ;;  %v4178_v58 = vand.u32 (!%p217_p9), 4294901760, %v286_v53 }
  0x15   : > { %s4941_s9 = smov (!%p247_p10, %s3412_s9), 7  ;;  %v358_v29 = vsub.f32 %v4085_v14, %v357_v19  ;;  %v369_v30 = vsub.f32 %v4088_v15, %v368_v20  ;;  %v380_v42 = vsub.f32 %v4091_v16, %v379_v23  ;;  %v401_v52 = vand.u32 4294901760, %v4140_v36 }
  0x16   : > { %s3413_s28 = sshll.u32 %s4941_s9, 3  ;;  %v391_v46 = vsub.f32 %v4108_v24, %v390_v35  ;;  %v4172_v54 = vsub.f32 %v283_v38, %v4166_v48  ;;  %v412_v57 = vand.u32 4294901760, %v4164_v47  ;;  %v4187_v62 = vsub.f32 %v286_v53, %v4178_v58 }
  0x17   : > { %s250_s11 = scalar_lea.vmem %s4917_s0, %s3413_s28  ;;  %v359_v33 = vand.u32 4294901760, %v358_v29  ;;  %v370_v39 = vand.u32 4294901760, %v369_v30  ;;  %v381_v51 = vand.u32 4294901760, %v380_v42  ;;  %v402_v56 = vsub.f32 %v4140_v36, %v401_v52  ;;  %s243_s28 = sand.u32 1, %s3958_s22  }
  0x18   : > { %v4102_v21 = vld [vmem:[%s250_s11 + $0x8] sm:$0xff]  ;;  %v4104_v22 = vld [vmem:[%s250_s11] sm:$0xff]  ;;  %v392_v55 = vand.u32 4294901760, %v391_v46  ;;  %v413_v60 = vsub.f32 %v4164_v47, %v412_v57  ;;  %v423_v61 = vand.u32 4294901760, %v4172_v54  ;;  %v434_v1 = vand.u32 4294901760, %v4187_v62  ;;  %s3411_s29 = sshll.u32 %s243_s28, 4 }
  0x19   : > { %v4114_v27 = vand.u32 4294901760, %v4102_v21  ;;  %v4117_v28 = vand.u32 4294901760, %v4104_v22  ;;  %v403_v59 = vand.u32 4294901760, %v402_v56  ;;  %vm1119_vm1 = vcmask 523264   ;;  %s245_s11 = scalar_lea.vmem [#allocation2], %s3411_s29  ;;  %s3334_s25 = scalar_lea.sflag [#allocation3], %s243_s28 }
  0x1a   : > { %v414_v63 = vand.u32 4294901760, %v413_v60  ;;  %v424_v0 = vsub.f32 %v4172_v54, %v423_v61  ;;  %v435_v4 = vsub.f32 %v4187_v62, %v434_v1  ;;  %s3348_s9 = sshll.u32 %s245_s11, 4  ;;  %s4877_s9 = int_to_ptr.vmem [resolvable:$true] %s3348_s9 }
  0x1b   : > { %289 = vmatprep.subr.mxu0 %v4114_v27  ;;  %v4131_v32 = vsub.f32 %v4104_v22, %v4117_v28  ;;  %v4135_v34 = vsub.f32 %v4102_v21, %v4114_v27  ;;  %s3904_s15 = scalar_lea.vmem %s4877_s9, 256  ;;  %p3911_p0 = scmp.lt.s32.totalorder %s4877_s9, %s3909_s17 }
  0x1c   : > { %291 = vmatpush1.msra.mxu0 %v4117_v28  ;;  %v425_v2 = vand.u32 4294901760, %v424_v0  ;;  %v436_v5 = vand.u32 4294901760, %v435_v4  ;;  %p3905_p11 = scmp.ne.s32.totalorder %s4877_s9, %s3904_s15  ;;  %p3912_p1 = scmp.lt.s32.totalorder %s3910_s18, %s3904_s15 }
  0x1d   : > { %360 = vmatmul.mubr.f32.vlgmr.msra.gmra.mrb[0].mxu0 %v359_v33  ;;  %v445_v40 = vand.u32 4294901760, %v4135_v34  ;;  %v451_v41 = vand.u32 4294901760, %v4131_v32 }
  0x1e   : > { %365 = vmatprep.mubr.f32.mxu0 %v3968_v3  ;;  %p3906_p12 = pnand %p3905_p11, %p4044_p5  ;;  %p3913_p2 = por %p3912_p1, %p3911_p0 }
  0x1f   : > { %v446_v43 = vsub.f32 %v4135_v34, %v445_v40  ;;  %v452_v44 = vsub.f32 %v4131_v32, %v451_v41 }
  0x20   : > { %p3907_p13 = pneg %p3906_p12 }
  0x21   : > { %371 = vmatmul.mubr.f32.gmra.mrb[2].mxu0 %v370_v39  ;;  %v447_v49 = vand.u32 4294901760, %v446_v43  ;;  %v453_v50 = vand.u32 4294901760, %v452_v44 }
  0x22   : > { %376 = vmatprep.mubr.f32.mxu0 %v3968_v3  ;;  %p3914_p3 = pnand %p3913_p2, %p3907_p13 }
  0x23   : > { %448 = vmatprep.subr.mxu0 %v447_v49 }
  0x24   : > { %454 = vmatpush1.msra.mxu0 %v453_v50 }
  0x25   : > { %382 = vmatmul.mubr.f32.gmra.mrb[4].mxu0 %v381_v51  ;;  %576 = vmatprep.subr.mxu0 %v4135_v34 }
  0x26   : > { %387 = vmatprep.mubr.f32.mxu0 %v3968_v3 }
  0x29   : > { %393 = vmatmul.mubr.f32.gmra.mrb[6].mxu0 %v392_v55 }
  0x2a   : > { %398 = vmatprep.mubr.f32.mxu0 %v3968_v3 }
  0x2d   : > { %404 = vmatmul.mubr.f32.gmra.mrb[8].mxu0 %v403_v59 }
  0x2e   : > { %409 = vmatprep.mubr.f32.mxu0 %v3968_v3 }
  0x31   : > { %415 = vmatmul.mubr.f32.gmra.mrb[10].mxu0 %v414_v63 }
  0x32   : > { %420 = vmatprep.mubr.f32.mxu0 %v3968_v3 }
  0x35   : > { %426 = vmatmul.mubr.f32.gmra.mrb[12].mxu0 %v425_v2 }
  0x36   : > { %431 = vmatprep.mubr.f32.mxu0 %v3968_v3 }
  0x39   : > { %437 = vmatmul.mubr.f32.gmra.mrb[14].mxu0 %v436_v5 }
  0x3a   : > { %517 = vmatprep.mubr.f32.mxu0 %v3968_v3 }
  0x3d   : > { %519 = vmatmul.mubr.f32.vlgmr.msra.gmra.mrb[0].mxu0 %v4075_v9 }
  0x3e   : > { %524 = vmatprep.mubr.f32.mxu0 %v3968_v3  ;;  %579 = vmatpush1.msra.mxu0 %v4131_v32 }
  0x3f   : > { %708 = vmatprep.subr.mxu0 %v4114_v27 }
  0x41   : > { %526 = vmatmul.mubr.f32.gmra.mrb[2].mxu0 %v4077_v10 }
  0x42   : > { %531 = vmatprep.mubr.f32.mxu0 %v3968_v3 }
  0x45   : > { %533 = vmatmul.mubr.f32.gmra.mrb[4].mxu0 %v4079_v11 }
  0x46   : > { %538 = vmatprep.mubr.f32.mxu0 %v3968_v3 }
  0x49   : > { %540 = vmatmul.mubr.f32.gmra.mrb[6].mxu0 %v4082_v13 }
  0x4a   : > { %545 = vmatprep.mubr.f32.mxu0 %v3968_v3 }
  0x4d   : > { %547 = vmatmul.mubr.f32.gmra.mrb[8].mxu0 %v4110_v25 }
  0x4e   : > { %552 = vmatprep.mubr.f32.mxu0 %v3968_v3 }
  0x51   : > { %554 = vmatmul.mubr.f32.gmra.mrb[10].mxu0 %v4142_v37 }
  0x52   : > { %559 = vmatprep.mubr.f32.mxu0 %v3968_v3 }
  0x55   : > { %561 = vmatmul.mubr.f32.gmra.mrb[12].mxu0 %v4166_v48 }
  0x56   : > { %566 = vmatprep.mubr.f32.mxu0 %v3968_v3 }
  0x59   : > { %568 = vmatmul.mubr.f32.gmra.mrb[14].mxu0 %v4178_v58 }
  0x5a   : > { %642 = vmatprep.mubr.f32.mxu0 %v3968_v3 }
  0x5d   : > { %645 = vmatmul.mubr.f32.vlgmr.msra.gmra.mrb[0].mxu0 %v4085_v14 }
  0x5e   : > { %650 = vmatprep.mubr.f32.mxu0 %v3968_v3  ;;  %710 = vmatpush1.msra.mxu0 %v4117_v28 }
  0x5f   : > { %849 = vmatprep.subr.mxu0 %v445_v40 }
  0x61   : > { %653 = vmatmul.mubr.f32.gmra.mrb[2].mxu0 %v4088_v15 }
  0x62   : > { %658 = vmatprep.mubr.f32.mxu0 %v3968_v3 }
  0x65   : > { %661 = vmatmul.mubr.f32.gmra.mrb[4].mxu0 %v4091_v16 }
  0x66   : > { %666 = vmatprep.mubr.f32.mxu0 %v3968_v3 }
  0x69   : > { %669 = vmatmul.mubr.f32.gmra.mrb[6].mxu0 %v4108_v24 }
  0x6a   : > { %674 = vmatprep.mubr.f32.mxu0 %v3968_v3 }
  0x6d   : > { %677 = vmatmul.mubr.f32.gmra.mrb[8].mxu0 %v4140_v36 }
  0x6e   : > { %682 = vmatprep.mubr.f32.mxu0 %v3968_v3 }
  0x71   : > { %685 = vmatmul.mubr.f32.gmra.mrb[10].mxu0 %v4164_v47 }
  0x72   : > { %690 = vmatprep.mubr.f32.mxu0 %v3968_v3 }
  0x75   : > { %693 = vmatmul.mubr.f32.gmra.mrb[12].mxu0 %v4172_v54 }
  0x76   : > { %698 = vmatprep.mubr.f32.mxu0 %v3968_v3 }
  0x79   : > { %701 = vmatmul.mubr.f32.gmra.mrb[14].mxu0 %v4187_v62 }
  0x7a   : > { %773 = vmatprep.mubr.f32.mxu0 %v3968_v3 }
  0x7d   : > { %777 = vmatmul.mubr.f32.vlgmr.msra.gmra.mrb[0].mxu0 %v357_v19 }
  0x7e   : > { %782 = vmatprep.mubr.f32.mxu0 %v3968_v3  ;;  %853 = vmatpush1.msra.mxu0 %v451_v41 }
  0x7f   : > { %974 = vmatprep.subr.mxu0 %v4114_v27 }
  0x81   : > { %786 = vmatmul.mubr.f32.gmra.mrb[2].mxu0 %v368_v20  ;;  %v1112_v20 = vld [vmem:[%s4919_s2] sm:$0xff] }
  0x82   : > { %791 = vmatprep.mubr.f32.mxu0 %v3968_v3  ;;  %v1121_v29 = vsel %vm1119_vm1, %v1112_v20, 0 }
  0x83   : > { %v4316_v40 = vand.u32 4294901760, %v1121_v29 }
  0x85   : > { %795 = vmatmul.mubr.f32.gmra.mrb[4].mxu0 %v379_v23 }
  0x86   : > { %800 = vmatprep.mubr.f32.mxu0 %v3968_v3 }
  0x89   : > { %804 = vmatmul.mubr.f32.gmra.mrb[6].mxu0 %v390_v35 }
  0x8a   : > { %809 = vmatprep.mubr.f32.mxu0 %v3968_v3 }
  0x8d   : > { %813 = vmatmul.mubr.f32.gmra.mrb[8].mxu0 %v401_v52 }
  0x8e   : > { %818 = vmatprep.mubr.f32.mxu0 %v3968_v3 }
  0x91   : > { %822 = vmatmul.mubr.f32.gmra.mrb[10].mxu0 %v412_v57 }
  0x92   : > { %827 = vmatprep.mubr.f32.mxu0 %v3968_v3 }
  0x95   : > { %831 = vmatmul.mubr.f32.gmra.mrb[12].mxu0 %v423_v61 }
  0x96   : > { %836 = vmatprep.mubr.f32.mxu0 %v3968_v3 }
  0x99   : > { %840 = vmatmul.mubr.f32.gmra.mrb[14].mxu0 %v434_v1 }
  0x9a   : > { %916 = vmatprep.mubr.f32.mxu0 %v3968_v3 }
  0x9d   : > { %918 = vmatmul.mubr.f32.vlgmr.msra.gmra.mrb[0].mxu0 %v4075_v9 }
  0x9e   : > { %923 = vmatprep.mubr.f32.mxu0 %v3968_v3  ;;  %976 = vmatpush1.msra.mxu0 %v4117_v28 }
  0xa1   : > { %925 = vmatmul.mubr.f32.gmra.mrb[2].mxu0 %v4077_v10 }
  0xa2   : > { %930 = vmatprep.mubr.f32.mxu0 %v3968_v3 }
  0xa5   : > { %932 = vmatmul.mubr.f32.gmra.mrb[4].mxu0 %v4079_v11 }
  0xa6   : > { %937 = vmatprep.mubr.f32.mxu0 %v3968_v3 }
  0xa9   : > { %939 = vmatmul.mubr.f32.gmra.mrb[6].mxu0 %v4082_v13 }
  0xaa   : > { %944 = vmatprep.mubr.f32.mxu0 %v3968_v3 }
  0xad   : > { %946 = vmatmul.mubr.f32.gmra.mrb[8].mxu0 %v4110_v25 }
  0xae   : > { %951 = vmatprep.mubr.f32.mxu0 %v3968_v3 }
  0xb1   : > { %953 = vmatmul.mubr.f32.gmra.mrb[10].mxu0 %v4142_v37 }
  0xb2   : > { %958 = vmatprep.mubr.f32.mxu0 %v3968_v3 }
  0xb5   : > { %960 = vmatmul.mubr.f32.gmra.mrb[12].mxu0 %v4166_v48 }
  0xb6   : > { %965 = vmatprep.mubr.f32.mxu0 %v3968_v3 }
  0xb9   : > { %967 = vmatmul.mubr.f32.gmra.mrb[14].mxu0 %v4178_v58 }
  0xba   : > { %1039 = vmatprep.mubr.f32.mxu0 %v3968_v3 }
  0xbd   : > { %1041 = vmatmul.mubr.f32.vlgmr.msra.gmra.mrb[0].mxu0 %v4075_v9  ;;  %v3969_v9 = vmov 0  }
  0xbe   : > { %1046 = vmatprep.mubr.f32.mxu0 %v3968_v3  ;;  %3835 = vset.pattern.permute.xlu0 %v3969_v9 }
  0xbf   : > { %1116 = vperm.xlu0 %3835, %v1113_v8  }
  0xc1   : > { %1048 = vmatmul.mubr.f32.gmra.mrb[2].mxu0 %v4077_v10 }
  0xc2   : > { %1053 = vmatprep.mubr.f32.mxu0 %v3968_v3 }
  0xc5   : > { %1055 = vmatmul.mubr.f32.gmra.mrb[4].mxu0 %v4079_v11 }
  0xc6   : > { %1060 = vmatprep.mubr.f32.mxu0 %v3968_v3 }
  0xc9   : > { %1062 = vmatmul.mubr.f32.gmra.mrb[6].mxu0 %v4082_v13 }
  0xca   : > { %1067 = vmatprep.mubr.f32.mxu0 %v3968_v3 }
  0xcd   : > { %1069 = vmatmul.mubr.f32.gmra.mrb[8].mxu0 %v4110_v25 }
  0xce   : > { %1074 = vmatprep.mubr.f32.mxu0 %v3968_v3 }
  0xd1   : > { %1076 = vmatmul.mubr.f32.gmra.mrb[10].mxu0 %v4142_v37 }
  0xd2   : > { %1081 = vmatprep.mubr.f32.mxu0 %v3968_v3 }
  0xd5   : > { %1083 = vmatmul.mubr.f32.gmra.mrb[12].mxu0 %v4166_v48 }
  0xd6   : > { %1088 = vmatprep.mubr.f32.mxu0 %v3968_v3 }
  0xd9   : > { %1090 = vmatmul.mubr.f32.gmra.mrb[14].mxu0 %v4178_v58 }
  0xda   : > { %2762 = vmatprep.mubr.f32.mxu0 %v3968_v3 }
 0x190   : > { %v1042_v6 = vpop.f32.mrb[0].mxu0 }
 0x191   : > { %3836 = vtanh.f32 %v1042_v6  ;;  %v1044_v7 = vpop.f32.mrb[1].mxu0 }
 0x192   : > { %3838 = vtanh.f32 %v1044_v7 }
 0x194   : > { %v1049_v10 = vpop.f32.mrb[2].mxu0 }
 0x195   : > { %3840 = vtanh.f32 %v1049_v10  ;;  %v1051_v11 = vpop.f32.mrb[3].mxu0 }
 0x196   : > { %3842 = vtanh.f32 %v1051_v11 }
 0x198   : > { %v1056_v12 = vpop.f32.mrb[4].mxu0 }
 0x199   : > { %3844 = vtanh.f32 %v1056_v12  ;;  %v1058_v13 = vpop.f32.mrb[5].mxu0 }
 0x19a   : > { %3846 = vtanh.f32 %v1058_v13  ;;  %v4352_v13 = vsub.f32 %v1121_v29, %v4316_v40 }
 0x19b   : > { %v3837_v14 = vpop.eup %3836 }
 0x19c   : > { %v3839_v15 = vpop.eup %3838  ;;  %v1063_v16 = vpop.f32.mrb[6].mxu0  ;;  %v1125_v17 = vand.u32 4294901760, %v3837_v14 }
 0x19d   : > { %3848 = vtanh.f32 %v1063_v16  ;;  %v1065_v18 = vpop.f32.mrb[7].mxu0  ;;  %v1123_v19 = vand.u32 4294901760, %v3839_v15 }
 0x19e   : > { %3850 = vtanh.f32 %v1065_v18  ;;  %v4300_v23 = vsub.f32 %v3837_v14, %v1125_v17 }
 0x19f   : > { %v3841_v24 = vpop.eup %3840  ;;  %v4302_v25 = vsub.f32 %v3839_v15, %v1123_v19 }
 0x1a0   : > { %v3843_v26 = vpop.eup %3842  ;;  %v1070_v27 = vpop.f32.mrb[8].mxu0  ;;  %v1129_v28 = vand.u32 4294901760, %v3841_v24  ;;  %v1223_v30 = vand.u32 4294901760, %v4300_v23 }
 0x1a1   : > { %3852 = vtanh.f32 %v1070_v27  ;;  %v1072_v31 = vpop.f32.mrb[9].mxu0  ;;  %v1127_v32 = vand.u32 4294901760, %v3843_v26  ;;  %v1217_v33 = vand.u32 4294901760, %v4302_v25 }
 0x1a2   : > { %3854 = vtanh.f32 %v1072_v31  ;;  %v4307_v34 = vpack.c.bf16 %v1129_v28, %v1125_v17  ;;  %v4309_v35 = vsub.f32 %v3841_v24, %v1129_v28  ;;  %v1224_v36 = vsub.f32 %v4300_v23, %v1223_v30 }
 0x1a3   : > { %v3845_v37 = vpop.eup %3844  ;;  %v4312_v38 = vpack.c.bf16 %v1127_v32, %v1123_v19  ;;  %v4314_v39 = vsub.f32 %v3843_v26, %v1127_v32  ;;  %v1218_v44 = vsub.f32 %v4302_v25, %v1217_v33 }
 0x1a4   : > { %v3847_v41 = vpop.eup %3846  ;;  %v1077_v42 = vpop.f32.mrb[10].mxu0  ;;  %v1133_v43 = vand.u32 4294901760, %v3845_v37  ;;  %v1235_v45 = vand.u32 4294901760, %v4309_v35  ;;  %v3454_v46 = vpack.c.bf16 %v4309_v35, %v4300_v23  ;;  %v1225_v50 = vand.u32 4294901760, %v1224_v36 }
 0x1a5   : > { %3856 = vtanh.f32 %v1077_v42  ;;  %v1079_v47 = vpop.f32.mrb[11].mxu0  ;;  %3421 = vmatprep.subr.bf16.mxu1 %v4312_v38  ;;  %v1131_v48 = vand.u32 4294901760, %v3847_v41  ;;  %v1229_v49 = vand.u32 4294901760, %v4314_v39  ;;  %v3452_v53 = vpack.c.bf16 %v4314_v39, %v4302_v25 }
 0x1a6   : > { %3858 = vtanh.f32 %v1079_v47  ;;  %3423 = vmatpush1.bf16.msra.mxu1 %v4307_v34  ;;  %v4325_v51 = vsub.f32 %v3845_v37, %v1133_v43  ;;  %v1236_v52 = vsub.f32 %v4309_v35, %v1235_v45  ;;  %v4335_v58 = vpack.c.bf16 %v1235_v45, %v1223_v30  ;;  %v1117_v35 = vpop.permute.xlu0 %1116 }
 0x1a7   : > { %v3849_v54 = vpop.eup %3848  ;;  %v4330_v55 = vsub.f32 %v3847_v41, %v1131_v48  ;;  %v1230_v56 = vsub.f32 %v4314_v39, %v1229_v49  ;;  %v4333_v57 = vpack.c.bf16 %v1229_v49, %v1217_v33  ;;  %v1219_v62 = vand.u32 4294901760, %v1218_v44 }
 0x1a8   : > { %v3851_v59 = vpop.eup %3850  ;;  %v1084_v60 = vpop.f32.mrb[12].mxu0  ;;  %v1137_v61 = vand.u32 4294901760, %v3849_v54  ;;  %v1237_v63 = vand.u32 4294901760, %v1236_v52  ;;  %v1247_v0 = vand.u32 4294901760, %v4325_v51  ;;  %v4931_v23 = vand.u32 4294901760, %v4352_v13 }
 0x1a9   : > { %3860 = vtanh.f32 %v1084_v60  ;;  %v1086_v1 = vpop.f32.mrb[13].mxu0  ;;  %v1135_v2 = vand.u32 4294901760, %v3851_v59  ;;  %v1231_v4 = vand.u32 4294901760, %v1230_v56  ;;  %v1241_v5 = vand.u32 4294901760, %v4330_v55 }
 0x1aa   : > { %3862 = vtanh.f32 %v1086_v1  ;;  %v4339_v6 = vpack.c.bf16 %v1137_v61, %v1133_v43  ;;  %v4341_v7 = vsub.f32 %v3849_v54, %v1137_v61  ;;  %v4343_v8 = vpack.c.bf16 %v1237_v63, %v1225_v50 }
 0x1ab   : > { %v3853_v9 = vpop.eup %3852  ;;  %v4345_v10 = vpack.c.bf16 %v1135_v2, %v1131_v48  ;;  %v4347_v11 = vsub.f32 %v3851_v59, %v1135_v2  ;;  %v4349_v12 = vpack.c.bf16 %v1231_v4, %v1219_v62  ;;  %v1248_v17 = vsub.f32 %v4325_v51, %v1247_v0 }
 0x1ac   : > { %v3855_v14 = vpop.eup %3854  ;;  %v1091_v15 = vpop.f32.mrb[14].mxu0  ;;  %v1141_v16 = vand.u32 4294901760, %v3853_v9  ;;  %v1259_v18 = vand.u32 4294901760, %v4341_v7  ;;  %v1242_v26 = vsub.f32 %v4330_v55, %v1241_v5  ;;  %v4924_v62 = vand.u32 4294901760, %v4352_v13 }
 0x1ad   : > { %3864 = vtanh.f32 %v1091_v15  ;;  %v1093_v20 = vpop.f32.mrb[15].mxu0  ;;  %3425 = vmatprep.subr.bf16.mxu1 %v4345_v10  ;;  %v1139_v24 = vand.u32 4294901760, %v3855_v14  ;;  %v1253_v27 = vand.u32 4294901760, %v4347_v11  ;;  %v1249_v29 = vand.u32 4294901760, %v1248_v17 }
 0x1ae   : > { %3866 = vtanh.f32 %v1093_v20  ;;  %3427 = vmatpush1.bf16.msra.mxu1 %v4339_v6  ;;  %v4362_v28 = vsub.f32 %v3853_v9, %v1141_v16  ;;  %v1260_v30 = vsub.f32 %v4341_v7, %v1259_v18  ;;  %v4373_v45 = vpack.c.bf16 %v1259_v18, %v1247_v0 }
 0x1af   : > { %v3857_v31 = vpop.eup %3856  ;;  %v4365_v32 = vsub.f32 %v3855_v14, %v1139_v24  ;;  %v1254_v33 = vsub.f32 %v4347_v11, %v1253_v27  ;;  %v4370_v37 = vpack.c.bf16 %v1253_v27, %v1241_v5  ;;  %v1243_v48 = vand.u32 4294901760, %v1242_v26 }
 0x1b0   : > { %v3859_v41 = vpop.eup %3858  ;;  %v1145_v42 = vand.u32 4294901760, %v3857_v31  ;;  %v1261_v43 = vand.u32 4294901760, %v1260_v30  ;;  %v1271_v44 = vand.u32 4294901760, %v4362_v28  ;;  %v1207_v27 = vsub.f32 %v4352_v13, %v4924_v62 }
 0x1b1   : > { %v1143_v47 = vand.u32 4294901760, %v3859_v41  ;;  %v1255_v49 = vand.u32 4294901760, %v1254_v33  ;;  %v1265_v50 = vand.u32 4294901760, %v4365_v32 }
 0x1b2   : > { %v4376_v52 = vpack.c.bf16 %v1145_v42, %v1141_v16  ;;  %v4378_v54 = vsub.f32 %v3857_v31, %v1145_v42  ;;  %v4380_v56 = vpack.c.bf16 %v1261_v43, %v1249_v29  ;;  %v1272_v2 = vsub.f32 %v4362_v28, %v1271_v44 }
 0x1b3   : > { %v3861_v59 = vpop.eup %3860  ;;  %v4382_v60 = vpack.c.bf16 %v1143_v47, %v1139_v24  ;;  %v4384_v61 = vsub.f32 %v3859_v41, %v1143_v47  ;;  %v3440_v63 = vpack.c.bf16 %v1255_v49, %v1243_v48  ;;  %v1266_v14 = vsub.f32 %v4365_v32, %v1265_v50 }
 0x1b4   : > { %v3863_v0 = vpop.eup %3862  ;;  %v1149_v1 = vand.u32 4294901760, %v3861_v59  ;;  %v1283_v4 = vand.u32 4294901760, %v4378_v54  ;;  %v4930_v25 = vpack.c.bf16 %v4378_v54, %v4362_v28 }
 0x1b5   : > { %3429 = vmatprep.subr.bf16.mxu1 %v4382_v60  ;;  %v1147_v9 = vand.u32 4294901760, %v3863_v0  ;;  %v1277_v15 = vand.u32 4294901760, %v4384_v61  ;;  %v3460_v16 = vpack.c.bf16 %v4384_v61, %v4365_v32  ;;  %v1273_v32 = vand.u32 4294901760, %v1272_v2 }
 0x1b6   : > { %3431 = vmatpush1.bf16.msra.mxu1 %v4376_v52  ;;  %v1294_v17 = vsub.f32 %v3861_v59, %v1149_v1  ;;  %v1284_v18 = vsub.f32 %v4378_v54, %v1283_v4  ;;  %v4398_v20 = vpack.c.bf16 %v1283_v4, %v1271_v44  ;;  %v1267_v47 = vand.u32 4294901760, %v1266_v14 }
 0x1b7   : > { %v3865_v24 = vpop.eup %3864  ;;  %v1288_v26 = vsub.f32 %v3863_v0, %v1147_v9  ;;  %v1278_v29 = vsub.f32 %v4384_v61, %v1277_v15  ;;  %v4404_v30 = vpack.c.bf16 %v1277_v15, %v1265_v50  ;;  %v1208_v2 = vand.u32 4294901760, %v1207_v27 }
 0x1b8   : > { %v3867_v31 = vpop.eup %3866  ;;  %v1153_v33 = vand.u32 4294901760, %v3865_v24  ;;  %v1285_v41 = vand.u32 4294901760, %v1284_v18  ;;  %v1295_v42 = vand.u32 4294901760, %v1294_v17 }
 0x1b9   : > { %v1151_v43 = vand.u32 4294901760, %v3867_v31  ;;  %v1279_v48 = vand.u32 4294901760, %v1278_v29  ;;  %v1289_v44 = vand.u32 4294901760, %v1288_v26 }
 0x1ba   : > { %v4406_v49 = vpack.c.bf16 %v1153_v33, %v1149_v1  ;;  %v1306_v59 = vsub.f32 %v3865_v24, %v1153_v33  ;;  %v3446_v0 = vpack.c.bf16 %v1285_v41, %v1273_v32  ;;  %v1296_v61 = vsub.f32 %v1294_v17, %v1295_v42 }
 0x1bb   : > { %v4408_v4 = vpack.c.bf16 %v1151_v43, %v1147_v9  ;;  %v1300_v62 = vsub.f32 %v3867_v31, %v1151_v43  ;;  %v3444_v5 = vpack.c.bf16 %v1279_v48, %v1267_v47  ;;  %v1290_v18 = vsub.f32 %v1288_v26, %v1289_v44  ;;  %v1826_v48 = vld [vmem:[%s4921_s4 + $0x20] sm:$0xff] }
 0x1bc   : > { %v1307_v50 = vand.u32 4294901760, %v1306_v59  ;;  %v3466_v15 = vpack.c.bf16 %v1306_v59, %v1294_v17  ;;  %v1297_v29 = vand.u32 4294901760, %v1296_v61 }
 0x1bd   : > { %3433 = vmatprep.subr.bf16.mxu1 %v4408_v4  ;;  %v1301_v19 = vand.u32 4294901760, %v1300_v62  ;;  %v3464_v36 = vpack.c.bf16 %v1300_v62, %v1288_v26  ;;  %v1291_v33 = vand.u32 4294901760, %v1290_v18  ;;  %v1843_v18 = vsel %vm263_vm0, %v1826_v48, 0 }
 0x1be   : > { %3435 = vmatpush1.bf16.msra.mxu1 %v4406_v49  ;;  %v1308_v14 = vsub.f32 %v1306_v59, %v1307_v50  ;;  %v3498_v1 = vpack.c.bf16 %v1307_v50, %v1295_v42 }
 0x1bf   : > { %3437 = vmatprep.subr.bf16.mxu1 %v4349_v12  ;;  %v1302_v24 = vsub.f32 %v1300_v62, %v1301_v19  ;;  %v3496_v9 = vpack.c.bf16 %v1301_v19, %v1289_v44  ;;  %v4929_v12 = vpack.c.bf16 %v4341_v7, %v4325_v51  ;;  %v1823_v7 = vld [vmem:[%s4921_s4 + $0x8] sm:$0xff]  ;;  %v1825_v62 = vld [vmem:[%s4921_s4 + $0x18] sm:$0xff] }
 0x1c0   : > { %v1309_v31 = vand.u32 4294901760, %v1308_v14 }
 0x1c1   : > { %1209 = vmatmul.mubr.f32.vlgmr.msra.gmra.mrb[0].mxu1 %v1208_v2  ;;  %v1303_v32 = vand.u32 4294901760, %v1302_v24  ;;  %v1827_v24 = vld [vmem:[%s4921_s4 + $0x28] sm:$0xff] }
 0x1c2   : > { %3439 = vmatpush1.bf16.msra.mxu1 %v4343_v8  ;;  %v3450_v17 = vpack.c.bf16 %v1309_v31, %v1297_v29  ;;  %1359 = vmatprep.mubr.f32.mxu1 %v3968_v3  ;;  %v4928_v8 = vpack.c.bf16 %v4347_v11, %v4330_v55  ;;  %v1834_v11 = vsel %vm263_vm0, %v1823_v7, 0 }
 0x1c3   : > { %3441 = vmatprep.subr.bf16.mxu1 %v3440_v63  ;;  %v3448_v26 = vpack.c.bf16 %v1303_v32, %v1291_v33  ;;  %v4486_v54 = vand.u32 4294901760, %v1834_v11 }
 0x1c5   : > { %v4498_v42 = vsub.f32 %v1834_v11, %v4486_v54  ;;  %v1829_v11 = vld [vmem:[%s4921_s4 + $0x38] sm:$0xff] }
 0x1c6   : > { %3443 = vmatpush1.bf16.msra.mxu1 %v4380_v56 }
 0x1c7   : > { %3445 = vmatprep.subr.bf16.mxu1 %v3444_v5 }
 0x1ca   : > { %3447 = vmatpush1.bf16.msra.mxu1 %v3446_v0 }
 0x1cb   : > { %3449 = vmatprep.subr.bf16.mxu1 %v3448_v26 }
 0x1ce   : > { %3451 = vmatpush1.bf16.msra.mxu1 %v3450_v17 }
 0x1cf   : > { %3453 = vmatprep.subr.bf16.mxu1 %v3452_v53 }
 0x1d1   : > { %1361 = vmatmul.mubr.f32.vlgmr.msra.gmra.mrb[0].mxu1 %v4316_v40 }
 0x1d2   : > { %3455 = vmatpush1.bf16.msra.mxu1 %v3454_v46  ;;  %1463 = vmatprep.mubr.f32.mxu1 %v3968_v3 }
 0x1d3   : > { %3457 = vmatprep.subr.bf16.mxu1 %v4928_v8  ;;  %v4533_v8 = vand.u32 4294901760, %v1843_v18 }
 0x1d6   : > { %3459 = vmatpush1.bf16.msra.mxu1 %v4929_v12 }
 0x1d7   : > { %3461 = vmatprep.subr.bf16.mxu1 %v3460_v16 }
 0x1da   : > { %3463 = vmatpush1.bf16.msra.mxu1 %v4930_v25  ;;  %v1846_v25 = vsel %vm263_vm0, %v1827_v24, 0 }
 0x1db   : > { %3465 = vmatprep.subr.bf16.mxu1 %v3464_v36 }
 0x1de   : > { %3467 = vmatpush1.bf16.msra.mxu1 %v3466_v15  ;;  %v1934_v15 = vand.u32 4294901760, %v4498_v42 }
 0x1df   : > { %3469 = vmatprep.subr.bf16.mxu1 %v4312_v38 }
 0x1e0   : > { %v1935_v26 = vsub.f32 %v4498_v42, %v1934_v15 }
 0x1e1   : > { %1466 = vmatmul.mubr.f32.vlgmr.msra.gmra.mrb[0].mxu1 %v4352_v13  ;;  %v1824_v13 = vld [vmem:[%s4921_s4 + $0x10] sm:$0xff] }
 0x1e2   : > { %3471 = vmatpush1.bf16.msra.mxu1 %v4307_v34  ;;  %1552 = vmatprep.mubr.f32.mxu1 %v3968_v3  ;;  %v1837_v56 = vsel %vm263_vm0, %v1824_v13, 0 }
 0x1e3   : > { %3473 = vmatprep.subr.bf16.mxu1 %v4345_v10  ;;  %v4494_v27 = vand.u32 4294901760, %v1837_v56 }
 0x1e5   : > { %v4508_v59 = vsub.f32 %v1837_v56, %v4494_v27 }
 0x1e6   : > { %3475 = vmatpush1.bf16.msra.mxu1 %v4339_v6 }
 0x1e7   : > { %3477 = vmatprep.subr.bf16.mxu1 %v4382_v60  ;;  %v1945_v31 = vand.u32 4294901760, %v4508_v59 }
 0x1ea   : > { %3479 = vmatpush1.bf16.msra.mxu1 %v4376_v52 }
 0x1eb   : > { %3481 = vmatprep.subr.bf16.mxu1 %v4408_v4 }
 0x1ee   : > { %3483 = vmatpush1.bf16.msra.mxu1 %v4406_v49 }
 0x1ef   : > { %3485 = vmatprep.subr.bf16.mxu1 %v4333_v57 }
 0x1f1   : > { %1556 = vmatmul.mubr.f32.vlgmr.msra.gmra.mrb[0].mxu1 %v4931_v23 }
 0x1f2   : > { %3487 = vmatpush1.bf16.msra.mxu1 %v4335_v58  ;;  %1674 = vmatprep.mubr.f32.mxu1 %v3968_v3 }
 0x1f3   : > { %3489 = vmatprep.subr.bf16.mxu1 %v4370_v37 }
 0x1f6   : > { %3491 = vmatpush1.bf16.msra.mxu1 %v4373_v45 }
 0x1f7   : > { %3493 = vmatprep.subr.bf16.mxu1 %v4404_v30 }
 0x1fa   : > { %3495 = vmatpush1.bf16.msra.mxu1 %v4398_v20 }
 0x1fb   : > { %3497 = vmatprep.subr.bf16.mxu1 %v3496_v9 }
 0x1fe   : > { %3499 = vmatpush1.bf16.msra.mxu1 %v3498_v1 }
 0x1ff   : > { %3501 = vmatprep.subr.bf16.mxu1 %v4312_v38 }
 0x201   : > { %1676 = vmatmul.mubr.f32.vlgmr.msra.gmra.mrb[0].mxu1 %v4316_v40 }
 0x202   : > { %3503 = vmatpush1.bf16.msra.mxu1 %v4307_v34  ;;  %1762 = vmatprep.mubr.f32.mxu1 %v3968_v3 }
 0x203   : > { %3505 = vmatprep.subr.bf16.mxu1 %v4345_v10 }
 0x206   : > { %3507 = vmatpush1.bf16.msra.mxu1 %v4339_v6  ;;  %v1792_v6 = vlaneseq }
 0x207   : > { %3509 = vmatprep.subr.bf16.mxu1 %v4382_v60 }
 0x208   : > { %v1793_v28 = vshrl.u32 %v1792_v6, 7 }
 0x20a   : > { %3511 = vmatpush1.bf16.msra.mxu1 %v4376_v52  ;;  %v1802_v63 = vsub.s32 1, %v1793_v28  ;;  %v1814_v20 = vsub.s32 0, %v1793_v28  ;;  %vm1796_vm2 = vcmp.eq.s32.totalorder %v1793_v28, 2  ;;  %vm1794_vm3 = vcmp.eq.s32.totalorder %v1793_v28, 0 }
 0x20b   : > { %3513 = vmatprep.subr.bf16.mxu1 %v4408_v4  ;;  %vm1795_vm4 = vcmp.eq.s32.totalorder %v1793_v28, 1 }
 0x20e   : > { %3515 = vmatpush1.bf16.msra.mxu1 %v4406_v49 }
 0x211   : > { %1764 = vmatmul.mubr.f32.vlgmr.msra.gmra.mrb[0].mxu1 %v4316_v40  ;;  %v1822_v40 = vld [vmem:[%s4921_s4] sm:$0xff] }
 0x212   : > { %1920 = vmatprep.mubr.f32.mxu1 %v3968_v3  ;;  %v1831_v58 = vsel %vm263_vm0, %v1822_v40, 0  ;;  %v4556_v40 = vand.u32 4294901760, %v1846_v25 }
 0x213   : > { %v4477_v10 = vand.u32 4294901760, %v1831_v58 }
 0x215   : > { %v4484_v52 = vsub.f32 %v1831_v58, %v4477_v10 }
 0x217   : > { %v1923_v41 = vand.u32 4294901760, %v4484_v52 }
 0x219   : > { %v1924_v50 = vsub.f32 %v4484_v52, %v1923_v41 }
 0x21b   : > { %v1925_v17 = vand.u32 4294901760, %v1924_v50 }
 0x2e4   : > { %v1765_v34 = vpop.f32.mrb[0].mxu1 }
 0x2e5   : > { %v4464_v38 = vadd.f32 %v1765_v34, %v1117_v35  ;;  %v1767_v39 = vpop.f32.mrb[1].mxu1 }
 0x2e6   : > { %v4466_v46 = vadd.f32 %v1767_v39, %v1117_v35  ;;  %v1828_v35 = vld [vmem:[%s4921_s4 + $0x30] sm:$0xff]  ;;  %v1946_v39 = vsub.f32 %v4508_v59, %v1945_v31 }
 0x2e7   : > { %v1770_v51 = vmul.f32 0.5, %v4464_v38  ;;  %v1849_v6 = vsel %vm263_vm0, %v1828_v35, 0 }
 0x2e8   : > { %v1771_v53 = vmul.f32 0.5, %v4466_v46  ;;  %v1947_v13 = vand.u32 4294901760, %v1946_v39 }
 0x2e9   : > { %v1772_v55 = vmul.f32 1.442695, %v1770_v51 }
 0x2ea   : > { %v1774_v57 = vmul.f32 1.442695, %v1771_v53  ;;  %v1936_v53 = vand.u32 4294901760, %v1935_v26 }
 0x2eb   : > { %3868 = vpow2.f32 %v1772_v55 }
 0x2ec   : > { %3870 = vpow2.f32 %v1774_v57  ;;  %v4554_v57 = vsub.f32 %v1843_v18, %v4533_v8 }
 0x2f5   : > { %v3869_v19 = vpop.eup %3868 }
 0x2f6   : > { %v3871_v36 = vpop.eup %3870  ;;  %v1778_v37 = vrot.slane %v3869_v19, 2 }
 0x2f7   : > { %v1779_v45 = vrot.slane %v3871_v36, 2  ;;  %v1967_v36 = vand.u32 4294901760, %v4554_v57 }
 0x2f8   : > { %v1782_v60 = vmul.f32 %v1778_v37, %v4104_v22  ;;  %v1840_v22 = vsel %vm263_vm0, %v1825_v62, 0  ;;  %v4574_v37 = vsub.f32 %v1846_v25, %v4556_v40 }
 0x2f9   : > { %v1783_v5 = vmul.f32 %v1779_v45, %v4102_v21  ;;  %v1797_v21 = vsel %vm1796_vm2, 1.0, %v3968_v3  ;;  %v4510_v0 = vand.u32 4294901760, %v1840_v22  ;;  %v4576_v45 = vand.u32 4294901760, %v1849_v6 }
 0x2fa   : > { %v1786_v16 = vrot.slane %v1782_v60, 2  ;;  %v1852_v60 = vsel %vm263_vm0, %v1829_v11, 0 }
 0x2fb   : > { %v1787_v30 = vrot.slane %v1783_v5, 2  ;;  %v4526_v33 = vsub.f32 %v1840_v22, %v4510_v0  ;;  %v1978_v5 = vand.u32 4294901760, %v4574_v37 }
 0x2fc   : > { %v1790_v43 = vadd.f32 %v4464_v38, %v1786_v16  ;;  %v4586_v16 = vsub.f32 %v1849_v6, %v4576_v45 }
 0x2fd   : > { %v1791_v47 = vadd.f32 %v4466_v46, %v1787_v30  ;;  %v1956_v51 = vand.u32 4294901760, %v4526_v33  ;;  %v1979_v22 = vsub.f32 %v4574_v37, %v1978_v5 }
 0x2fe   : > { %v1803_v44 = vrot.slane %v1790_v43, %v1802_v63  ;;  %v1815_v49 = vrot.slane %v1790_v43, %v1814_v20  ;;  %v1989_v43 = vand.u32 4294901760, %v4586_v16 }
 0x2ff   : > { %v1807_v4 = vrot.slane %v1791_v47, %v1802_v63  ;;  %v1819_v61 = vrot.slane %v1791_v47, %v1814_v20  ;;  %v1957_v19 = vsub.f32 %v4526_v33, %v1956_v51  ;;  %v1968_v63 = vsub.f32 %v4554_v57, %v1967_v36 }
 0x300   : > { %v1808_v2 = vsel %vm1795_vm4, %v1803_v44, %v1797_v21  ;;  %v4588_v20 = vand.u32 4294901760, %v1852_v60  ;;  %v1990_v48 = vsub.f32 %v4586_v16, %v1989_v43 }
 0x301   : > { %v1809_v14 = vsel %vm1795_vm4, %v1807_v4, %v1797_v21  ;;  %v1820_v1 = vsel %vm1794_vm3, %v1815_v49, %v1808_v2  ;;  %v1958_v62 = vand.u32 4294901760, %v1957_v19  ;;  %v1969_v30 = vand.u32 4294901760, %v1968_v63  ;;  %v2678_v2 = vld [vmem:[%s4922_s5] sm:$0xff] }
 0x302   : > { %v1821_v9 = vsel %vm1794_vm3, %v1819_v61, %v1809_v14  ;;  %v4522_v29 = vand.u32 4294901760, %v1820_v1  ;;  %v4596_v47 = vsub.f32 %v1852_v60, %v4588_v20  ;;  %v1980_v21 = vand.u32 4294901760, %v1979_v22 }
 0x303   : > { %v4528_v32 = vand.u32 4294901760, %v1821_v9  ;;  %v1991_v49 = vand.u32 4294901760, %v1990_v48 }
 0x304   : > { %v4536_v12 = vsub.f32 %v1820_v1, %v4522_v29  ;;  %v2000_v44 = vand.u32 4294901760, %v4596_v47 }
 0x305   : > { %1855 = vmatprep.subr.mxu1 %v4528_v32  ;;  %v4541_v23 = vsub.f32 %v1821_v9, %v4528_v32 }
 0x306   : > { %1857 = vmatpush1.msra.mxu1 %v4522_v29  ;;  %v2017_v34 = vand.u32 4294901760, %v4536_v12  ;;  %v2001_v4 = vsub.f32 %v4596_v47, %v2000_v44 }
 0x307   : > { %1926 = vmatmul.mubr.f32.vlgmr.msra.gmra.mrb[2].mxu1 %v1925_v17  ;;  %v2011_v55 = vand.u32 4294901760, %v4541_v23 }
 0x308   : > { %1931 = vmatprep.mubr.f32.mxu1 %v3968_v3  ;;  %v2018_v58 = vsub.f32 %v4536_v12, %v2017_v34  ;;  %v2002_v61 = vand.u32 4294901760, %v2001_v4 }
 0x309   : > { %v2012_v7 = vsub.f32 %v4541_v23, %v2011_v55 }
 0x30a   : > { %v2019_v56 = vand.u32 4294901760, %v2018_v58 }
 0x30b   : > { %1937 = vmatmul.mubr.f32.gmra.mrb[4].mxu1 %v1936_v53  ;;  %v2013_v28 = vand.u32 4294901760, %v2012_v7 }
 0x30c   : > { %1942 = vmatprep.mubr.f32.mxu1 %v3968_v3 }
 0x30d   : > { %2014 = vmatprep.subr.mxu1 %v2013_v28 }
 0x30e   : > { %2020 = vmatpush1.msra.mxu1 %v2019_v56 }
 0x30f   : > { %1948 = vmatmul.mubr.f32.gmra.mrb[6].mxu1 %v1947_v13  ;;  %2142 = vmatprep.subr.mxu1 %v4541_v23 }
 0x310   : > { %1953 = vmatprep.mubr.f32.mxu1 %v3968_v3 }
 0x313   : > { %1959 = vmatmul.mubr.f32.gmra.mrb[8].mxu1 %v1958_v62 }
 0x314   : > { %1964 = vmatprep.mubr.f32.mxu1 %v3968_v3 }
 0x317   : > { %1970 = vmatmul.mubr.f32.gmra.mrb[10].mxu1 %v1969_v30 }
 0x318   : > { %1975 = vmatprep.mubr.f32.mxu1 %v3968_v3 }
 0x31b   : > { %1981 = vmatmul.mubr.f32.gmra.mrb[12].mxu1 %v1980_v21 }
 0x31c   : > { %1986 = vmatprep.mubr.f32.mxu1 %v3968_v3 }
 0x31f   : > { %1992 = vmatmul.mubr.f32.gmra.mrb[14].mxu1 %v1991_v49 }
 0x320   : > { %1997 = vmatprep.mubr.f32.mxu1 %v3968_v3 }
 0x323   : > { %2003 = vmatmul.mubr.f32.gmra.mrb[16].mxu1 %v2002_v61 }
 0x324   : > { %2083 = vmatprep.mubr.f32.mxu1 %v3968_v3 }
 0x327   : > { %2085 = vmatmul.mubr.f32.vlgmr.msra.gmra.mrb[2].mxu1 %v4477_v10 }
 0x328   : > { %2145 = vmatpush1.msra.mxu1 %v4536_v12  ;;  %2090 = vmatprep.mubr.f32.mxu1 %v3968_v3 }
 0x329   : > { %2274 = vmatprep.subr.mxu1 %v4528_v32 }
 0x32b   : > { %2092 = vmatmul.mubr.f32.gmra.mrb[4].mxu1 %v4486_v54 }
 0x32c   : > { %2097 = vmatprep.mubr.f32.mxu1 %v3968_v3 }
 0x32f   : > { %2099 = vmatmul.mubr.f32.gmra.mrb[6].mxu1 %v4494_v27 }
 0x330   : > { %2104 = vmatprep.mubr.f32.mxu1 %v3968_v3 }
 0x333   : > { %2106 = vmatmul.mubr.f32.gmra.mrb[8].mxu1 %v4510_v0 }
 0x334   : > { %2111 = vmatprep.mubr.f32.mxu1 %v3968_v3 }
 0x337   : > { %2113 = vmatmul.mubr.f32.gmra.mrb[10].mxu1 %v4533_v8 }
 0x338   : > { %2118 = vmatprep.mubr.f32.mxu1 %v3968_v3 }
 0x33b   : > { %2120 = vmatmul.mubr.f32.gmra.mrb[12].mxu1 %v4556_v40 }
 0x33c   : > { %2125 = vmatprep.mubr.f32.mxu1 %v3968_v3 }
 0x33f   : > { %2127 = vmatmul.mubr.f32.gmra.mrb[14].mxu1 %v4576_v45 }
 0x340   : > { %2132 = vmatprep.mubr.f32.mxu1 %v3968_v3 }
 0x343   : > { %2134 = vmatmul.mubr.f32.gmra.mrb[16].mxu1 %v4588_v20 }
 0x344   : > { %2208 = vmatprep.mubr.f32.mxu1 %v3968_v3 }
 0x347   : > { %2211 = vmatmul.mubr.f32.vlgmr.msra.gmra.mrb[2].mxu1 %v4484_v52 }
 0x348   : > { %2276 = vmatpush1.msra.mxu1 %v4522_v29  ;;  %2216 = vmatprep.mubr.f32.mxu1 %v3968_v3 }
 0x349   : > { %2415 = vmatprep.subr.mxu1 %v2011_v55 }
 0x34b   : > { %2219 = vmatmul.mubr.f32.gmra.mrb[4].mxu1 %v4498_v42 }
 0x34c   : > { %2224 = vmatprep.mubr.f32.mxu1 %v3968_v3 }
 0x34f   : > { %2227 = vmatmul.mubr.f32.gmra.mrb[6].mxu1 %v4508_v59 }
 0x350   : > { %2232 = vmatprep.mubr.f32.mxu1 %v3968_v3 }
 0x353   : > { %2235 = vmatmul.mubr.f32.gmra.mrb[8].mxu1 %v4526_v33 }
 0x354   : > { %2240 = vmatprep.mubr.f32.mxu1 %v3968_v3 }
 0x357   : > { %2243 = vmatmul.mubr.f32.gmra.mrb[10].mxu1 %v4554_v57 }
 0x358   : > { %2248 = vmatprep.mubr.f32.mxu1 %v3968_v3 }
 0x35b   : > { %2251 = vmatmul.mubr.f32.gmra.mrb[12].mxu1 %v4574_v37 }
 0x35c   : > { %2256 = vmatprep.mubr.f32.mxu1 %v3968_v3 }
 0x35f   : > { %2259 = vmatmul.mubr.f32.gmra.mrb[14].mxu1 %v4586_v16 }
 0x360   : > { %2264 = vmatprep.mubr.f32.mxu1 %v3968_v3 }
 0x363   : > { %2267 = vmatmul.mubr.f32.gmra.mrb[16].mxu1 %v4596_v47 }
 0x364   : > { %2339 = vmatprep.mubr.f32.mxu1 %v3968_v3 }
 0x367   : > { %2343 = vmatmul.mubr.f32.vlgmr.msra.gmra.mrb[2].mxu1 %v1923_v41 }
 0x368   : > { %2419 = vmatpush1.msra.mxu1 %v2017_v34  ;;  %2348 = vmatprep.mubr.f32.mxu1 %v3968_v3 }
 0x369   : > { %2540 = vmatprep.subr.mxu1 %v4528_v32 }
 0x36b   : > { %2352 = vmatmul.mubr.f32.gmra.mrb[4].mxu1 %v1934_v15 }
 0x36c   : > { %2357 = vmatprep.mubr.f32.mxu1 %v3968_v3 }
 0x36f   : > { %2361 = vmatmul.mubr.f32.gmra.mrb[6].mxu1 %v1945_v31  ;;  %v2680_v31 = vsel %vm1119_vm1, %v2678_v2, 0 }
 0x370   : > { %2366 = vmatprep.mubr.f32.mxu1 %v3968_v3  ;;  %v4717_v39 = vand.u32 4294901760, %v2680_v31 }
 0x373   : > { %2370 = vmatmul.mubr.f32.gmra.mrb[8].mxu1 %v1956_v51 }
 0x374   : > { %2375 = vmatprep.mubr.f32.mxu1 %v3968_v3 }
 0x377   : > { %2379 = vmatmul.mubr.f32.gmra.mrb[10].mxu1 %v1967_v36 }
 0x378   : > { %2384 = vmatprep.mubr.f32.mxu1 %v3968_v3 }
 0x37b   : > { %2388 = vmatmul.mubr.f32.gmra.mrb[12].mxu1 %v1978_v5 }
 0x37c   : > { %2393 = vmatprep.mubr.f32.mxu1 %v3968_v3 }
 0x37f   : > { %2397 = vmatmul.mubr.f32.gmra.mrb[14].mxu1 %v1989_v43 }
 0x380   : > { %2402 = vmatprep.mubr.f32.mxu1 %v3968_v3 }
 0x383   : > { %2406 = vmatmul.mubr.f32.gmra.mrb[16].mxu1 %v2000_v44 }
 0x384   : > { %2482 = vmatprep.mubr.f32.mxu1 %v3968_v3 }
 0x387   : > { %2484 = vmatmul.mubr.f32.vlgmr.msra.gmra.mrb[2].mxu1 %v4477_v10 }
 0x388   : > { %2542 = vmatpush1.msra.mxu1 %v4522_v29  ;;  %2489 = vmatprep.mubr.f32.mxu1 %v3968_v3 }
 0x38b   : > { %2491 = vmatmul.mubr.f32.gmra.mrb[4].mxu1 %v4486_v54 }
 0x38c   : > { %2496 = vmatprep.mubr.f32.mxu1 %v3968_v3 }
 0x38f   : > { %2498 = vmatmul.mubr.f32.gmra.mrb[6].mxu1 %v4494_v27 }
 0x390   : > { %2503 = vmatprep.mubr.f32.mxu1 %v3968_v3 }
 0x393   : > { %2505 = vmatmul.mubr.f32.gmra.mrb[8].mxu1 %v4510_v0 }
 0x394   : > { %2510 = vmatprep.mubr.f32.mxu1 %v3968_v3 }
 0x397   : > { %2512 = vmatmul.mubr.f32.gmra.mrb[10].mxu1 %v4533_v8 }
 0x398   : > { %2517 = vmatprep.mubr.f32.mxu1 %v3968_v3 }
 0x39b   : > { %2519 = vmatmul.mubr.f32.gmra.mrb[12].mxu1 %v4556_v40 }
 0x39c   : > { %2524 = vmatprep.mubr.f32.mxu1 %v3968_v3 }
 0x39f   : > { %2526 = vmatmul.mubr.f32.gmra.mrb[14].mxu1 %v4576_v45 }
 0x3a0   : > { %2531 = vmatprep.mubr.f32.mxu1 %v3968_v3 }
 0x3a3   : > { %2533 = vmatmul.mubr.f32.gmra.mrb[16].mxu1 %v4588_v20 }
 0x3a4   : > { %2605 = vmatprep.mubr.f32.mxu1 %v3968_v3 }
 0x3a7   : > { %2607 = vmatmul.mubr.f32.vlgmr.msra.gmra.mrb[2].mxu1 %v4477_v10 }
 0x3a8   : > { %2612 = vmatprep.mubr.f32.mxu1 %v3968_v3 }
 0x3ab   : > { %2614 = vmatmul.mubr.f32.gmra.mrb[4].mxu1 %v4486_v54 }
 0x3ac   : > { %2619 = vmatprep.mubr.f32.mxu1 %v3968_v3 }
 0x3af   : > { %2621 = vmatmul.mubr.f32.gmra.mrb[6].mxu1 %v4494_v27 }
 0x3b0   : > { %2626 = vmatprep.mubr.f32.mxu1 %v3968_v3 }
 0x3b3   : > { %2628 = vmatmul.mubr.f32.gmra.mrb[8].mxu1 %v4510_v0 }
 0x3b4   : > { %2633 = vmatprep.mubr.f32.mxu1 %v3968_v3 }
 0x3b7   : > { %2635 = vmatmul.mubr.f32.gmra.mrb[10].mxu1 %v4533_v8 }
 0x3b8   : > { %2640 = vmatprep.mubr.f32.mxu1 %v3968_v3 }
 0x3bb   : > { %2642 = vmatmul.mubr.f32.gmra.mrb[12].mxu1 %v4556_v40 }
 0x3bc   : > { %2647 = vmatprep.mubr.f32.mxu1 %v3968_v3 }
 0x3bf   : > { %2649 = vmatmul.mubr.f32.gmra.mrb[14].mxu1 %v4576_v45 }
 0x3c0   : > { %2654 = vmatprep.mubr.f32.mxu1 %v3968_v3 }
 0x3c3   : > { %2656 = vmatmul.mubr.f32.gmra.mrb[16].mxu1 %v4588_v20 }
 0x47a   : > { %v2608_v10 = vpop.f32.mrb[2].mxu1 }
 0x47b   : > { %3872 = vtanh.f32 %v2608_v10  ;;  %v2610_v52 = vpop.f32.mrb[3].mxu1 }
 0x47c   : > { %3874 = vtanh.f32 %v2610_v52 }
 0x47e   : > { %v2615_v54 = vpop.f32.mrb[4].mxu1 }
 0x47f   : > { %3876 = vtanh.f32 %v2615_v54  ;;  %v2617_v27 = vpop.f32.mrb[5].mxu1  ;;  %v4751_v54 = vsub.f32 %v2680_v31, %v4717_v39 }
 0x480   : > { %3878 = vtanh.f32 %v2617_v27 }
 0x482   : > { %v2622_v41 = vpop.f32.mrb[6].mxu1 }
 0x483   : > { %3880 = vtanh.f32 %v2622_v41  ;;  %v2624_v42 = vpop.f32.mrb[7].mxu1 }
 0x484   : > { %3882 = vtanh.f32 %v2624_v42 }
 0x485   : > { %v3873_v59 = vpop.eup %3872 }
 0x486   : > { %v3875_v0 = vpop.eup %3874  ;;  %v2629_v50 = vpop.f32.mrb[8].mxu1  ;;  %v2684_v15 = vand.u32 4294901760, %v3873_v59 }
 0x487   : > { %3884 = vtanh.f32 %v2629_v50  ;;  %v2631_v18 = vpop.f32.mrb[9].mxu1  ;;  %v2682_v14 = vand.u32 4294901760, %v3875_v0 }
 0x488   : > { %3886 = vtanh.f32 %v2631_v18  ;;  %v4705_v1 = vsub.f32 %v3873_v59, %v2684_v15 }
 0x489   : > { %v3877_v24 = vpop.eup %3876  ;;  %v4707_v9 = vsub.f32 %v3875_v0, %v2682_v14 }
 0x48a   : > { %v3879_v29 = vpop.eup %3878  ;;  %v2636_v33 = vpop.f32.mrb[10].mxu1  ;;  %v2688_v32 = vand.u32 4294901760, %v3877_v24  ;;  %v2782_v17 = vand.u32 4294901760, %v4705_v1 }
 0x48b   : > { %3888 = vtanh.f32 %v2636_v33  ;;  %v2638_v26 = vpop.f32.mrb[11].mxu1  ;;  %v2686_v8 = vand.u32 4294901760, %v3879_v29  ;;  %v2776_v12 = vand.u32 4294901760, %v4707_v9 }
 0x48c   : > { %3890 = vtanh.f32 %v2638_v26  ;;  %v4712_v25 = vpack.c.bf16 %v2688_v32, %v2684_v15  ;;  %v4714_v23 = vsub.f32 %v3877_v24, %v2688_v32  ;;  %v2783_v35 = vsub.f32 %v4705_v1, %v2782_v17 }
 0x48d   : > { %v3881_v34 = vpop.eup %3880  ;;  %v4719_v51 = vpack.c.bf16 %v2686_v8, %v2682_v14  ;;  %v4721_v53 = vsub.f32 %v3879_v29, %v2686_v8  ;;  %v2777_v58 = vsub.f32 %v4707_v9, %v2776_v12 }
 0x48e   : > { %v3883_v55 = vpop.eup %3882  ;;  %v2643_v57 = vpop.f32.mrb[12].mxu1  ;;  %v2692_v40 = vand.u32 4294901760, %v3881_v34  ;;  %v2794_v6 = vand.u32 4294901760, %v4714_v23  ;;  %v3550_v7 = vpack.c.bf16 %v4714_v23, %v4705_v1  ;;  %v2784_v28 = vand.u32 4294901760, %v2783_v35 }
 0x48f   : > { %3892 = vtanh.f32 %v2643_v57  ;;  %v2645_v11 = vpop.f32.mrb[13].mxu1  ;;  %3517 = vmatprep.subr.bf16.mxu0 %v4719_v51  ;;  %v2690_v13 = vand.u32 4294901760, %v3883_v55  ;;  %v2788_v19 = vand.u32 4294901760, %v4721_v53  ;;  %v3548_v45 = vpack.c.bf16 %v4721_v53, %v4707_v9 }
 0x490   : > { %3894 = vtanh.f32 %v2645_v11  ;;  %3519 = vmatpush1.bf16.msra.mxu0 %v4712_v25  ;;  %v4730_v36 = vsub.f32 %v3881_v34, %v2692_v40  ;;  %v2795_v37 = vsub.f32 %v4714_v23, %v2794_v6  ;;  %v4740_v5 = vpack.c.bf16 %v2794_v6, %v2782_v17 }
 0x491   : > { %v3885_v56 = vpop.eup %3884  ;;  %v4735_v60 = vsub.f32 %v3883_v55, %v2690_v13  ;;  %v2789_v62 = vsub.f32 %v4721_v53, %v2788_v19  ;;  %v4738_v63 = vpack.c.bf16 %v2788_v19, %v2776_v12  ;;  %v2778_v22 = vand.u32 4294901760, %v2777_v58 }
 0x492   : > { %v3887_v16 = vpop.eup %3886  ;;  %v2650_v20 = vpop.f32.mrb[14].mxu1  ;;  %v2696_v30 = vand.u32 4294901760, %v3885_v56  ;;  %v2796_v43 = vand.u32 4294901760, %v2795_v37  ;;  %v2806_v47 = vand.u32 4294901760, %v4730_v36  ;;  %v4935_v1 = vand.u32 4294901760, %v4751_v54 }
 0x493   : > { %3896 = vtanh.f32 %v2650_v20  ;;  %v2652_v21 = vpop.f32.mrb[15].mxu1  ;;  %v2694_v48 = vand.u32 4294901760, %v3887_v16  ;;  %v2790_v44 = vand.u32 4294901760, %v2789_v62  ;;  %v2800_v49 = vand.u32 4294901760, %v4735_v60 }
 0x494   : > { %3898 = vtanh.f32 %v2652_v21  ;;  %v4744_v4 = vpack.c.bf16 %v2696_v30, %v2692_v40  ;;  %v4746_v61 = vsub.f32 %v3885_v56, %v2696_v30  ;;  %v4748_v10 = vpack.c.bf16 %v2796_v43, %v2784_v28 }
 0x495   : > { %v3889_v52 = vpop.eup %3888  ;;  %v4753_v27 = vpack.c.bf16 %v2694_v48, %v2690_v13  ;;  %v4755_v41 = vsub.f32 %v3887_v16, %v2694_v48  ;;  %v4757_v42 = vpack.c.bf16 %v2790_v44, %v2778_v22  ;;  %v2807_v15 = vsub.f32 %v4730_v36, %v2806_v47 }
 0x496   : > { %v3891_v59 = vpop.eup %3890  ;;  %v2657_v0 = vpop.f32.mrb[16].mxu1  ;;  %v2700_v50 = vand.u32 4294901760, %v3889_v52  ;;  %v2818_v2 = vand.u32 4294901760, %v4746_v61  ;;  %v2801_v29 = vsub.f32 %v4735_v60, %v2800_v49  ;;  %v4925_v22 = vand.u32 4294901760, %v4751_v54 }
 0x497   : > { %3900 = vtanh.f32 %v2657_v0  ;;  %v2659_v14 = vpop.f32.mrb[17].mxu1  ;;  %3521 = vmatprep.subr.bf16.mxu0 %v4753_v27  ;;  %v2698_v24 = vand.u32 4294901760, %v3891_v59  ;;  %v2812_v31 = vand.u32 4294901760, %v4755_v41  ;;  %v2808_v32 = vand.u32 4294901760, %v2807_v15 }
 0x498   : > { %3902 = vtanh.f32 %v2659_v14  ;;  %3523 = vmatpush1.bf16.msra.mxu0 %v4744_v4  ;;  %v4767_v33 = vsub.f32 %v3889_v52, %v2700_v50  ;;  %v2819_v17 = vsub.f32 %v4746_v61, %v2818_v2  ;;  %v4778_v6 = vpack.c.bf16 %v2818_v2, %v2806_v47 }
 0x499   : > { %v3893_v26 = vpop.eup %3892  ;;  %v4770_v8 = vsub.f32 %v3891_v59, %v2698_v24  ;;  %v2813_v12 = vsub.f32 %v4755_v41, %v2812_v31  ;;  %v4775_v34 = vpack.c.bf16 %v2812_v31, %v2800_v49  ;;  %v2802_v13 = vand.u32 4294901760, %v2801_v29 }
 0x49a   : > { %v3895_v55 = vpop.eup %3894  ;;  %v2704_v57 = vand.u32 4294901760, %v3893_v26  ;;  %v2820_v40 = vand.u32 4294901760, %v2819_v17  ;;  %v2830_v58 = vand.u32 4294901760, %v4767_v33  ;;  %v2766_v31 = vsub.f32 %v4751_v54, %v4925_v22 }
 0x49b   : > { %v2702_v11 = vand.u32 4294901760, %v3895_v55  ;;  %v2814_v19 = vand.u32 4294901760, %v2813_v12  ;;  %v2824_v28 = vand.u32 4294901760, %v4770_v8 }
 0x49c   : > { %v4781_v37 = vpack.c.bf16 %v2704_v57, %v2700_v50  ;;  %v4783_v56 = vsub.f32 %v3893_v26, %v2704_v57  ;;  %v4785_v62 = vpack.c.bf16 %v2820_v40, %v2808_v32  ;;  %v2831_v48 = vsub.f32 %v4767_v33, %v2830_v58 }
 0x49d   : > { %v3897_v16 = vpop.eup %3896  ;;  %v4787_v20 = vpack.c.bf16 %v2702_v11, %v2698_v24  ;;  %v4789_v30 = vsub.f32 %v3895_v55, %v2702_v11  ;;  %v3536_v43 = vpack.c.bf16 %v2814_v19, %v2802_v13  ;;  %v2825_v59 = vsub.f32 %v4770_v8, %v2824_v28 }
 0x49e   : > { %v3899_v47 = vpop.eup %3898  ;;  %v2708_v21 = vand.u32 4294901760, %v3897_v16  ;;  %v2842_v44 = vand.u32 4294901760, %v4783_v56  ;;  %v4934_v9 = vpack.c.bf16 %v4783_v56, %v4767_v33 }
 0x49f   : > { %3525 = vmatprep.subr.bf16.mxu0 %v4787_v20  ;;  %v2706_v52 = vand.u32 4294901760, %v3899_v47  ;;  %v2836_v0 = vand.u32 4294901760, %v4789_v30  ;;  %v3556_v50 = vpack.c.bf16 %v4789_v30, %v4770_v8  ;;  %v2832_v8 = vand.u32 4294901760, %v2831_v48 }
 0x4a0   : > { %3527 = vmatpush1.bf16.msra.mxu0 %v4781_v37  ;;  %v2853_v15 = vsub.f32 %v3897_v16, %v2708_v21  ;;  %v2843_v2 = vsub.f32 %v4783_v56, %v2842_v44  ;;  %v4803_v14 = vpack.c.bf16 %v2842_v44, %v2830_v58  ;;  %v2826_v11 = vand.u32 4294901760, %v2825_v59 }
 0x4a1   : > { %v3901_v24 = vpop.eup %3900  ;;  %v2847_v29 = vsub.f32 %v3899_v47, %v2706_v52  ;;  %v2837_v32 = vsub.f32 %v4789_v30, %v2836_v0  ;;  %v4809_v17 = vpack.c.bf16 %v2836_v0, %v2824_v28  ;;  %v2767_v48 = vand.u32 4294901760, %v2766_v31 }
 0x4a2   : > { %v3903_v26 = vpop.eup %3902  ;;  %v2712_v12 = vand.u32 4294901760, %v3901_v24  ;;  %v2844_v55 = vand.u32 4294901760, %v2843_v2  ;;  %v2854_v57 = vand.u32 4294901760, %v2853_v15 }
 0x4a3   : > { %v2710_v40 = vand.u32 4294901760, %v3903_v26  ;;  %v2838_v13 = vand.u32 4294901760, %v2837_v32  ;;  %v2848_v58 = vand.u32 4294901760, %v2847_v29 }
 0x4a4   : > { %v4811_v19 = vpack.c.bf16 %v2712_v12, %v2708_v21  ;;  %v2865_v16 = vsub.f32 %v3901_v24, %v2712_v12  ;;  %v3542_v47 = vpack.c.bf16 %v2844_v55, %v2832_v8  ;;  %v2855_v30 = vsub.f32 %v2853_v15, %v2854_v57 }
 0x4a5   : > { %v4813_v44 = vpack.c.bf16 %v2710_v40, %v2706_v52  ;;  %v2859_v22 = vsub.f32 %v3903_v26, %v2710_v40  ;;  %v3540_v49 = vpack.c.bf16 %v2838_v13, %v2826_v11  ;;  %v2849_v2 = vsub.f32 %v2847_v29, %v2848_v58 }
 0x4a6   : > { %v2866_v28 = vand.u32 4294901760, %v2865_v16  ;;  %v3562_v0 = vpack.c.bf16 %v2865_v16, %v2853_v15  ;;  %v2856_v32 = vand.u32 4294901760, %v2855_v30 }
 0x4a7   : > { %3529 = vmatprep.subr.bf16.mxu0 %v4813_v44  ;;  %v2860_v18 = vand.u32 4294901760, %v2859_v22  ;;  %v3560_v35 = vpack.c.bf16 %v2859_v22, %v2847_v29  ;;  %v2850_v12 = vand.u32 4294901760, %v2849_v2 }
 0x4a8   : > { %3531 = vmatpush1.bf16.msra.mxu0 %v4811_v19  ;;  %v2867_v59 = vsub.f32 %v2865_v16, %v2866_v28  ;;  %v3594_v21 = vpack.c.bf16 %v2866_v28, %v2854_v57 }
 0x4a9   : > { %3533 = vmatprep.subr.bf16.mxu0 %v4757_v42  ;;  %v2861_v24 = vsub.f32 %v2859_v22, %v2860_v18  ;;  %v3592_v52 = vpack.c.bf16 %v2860_v18, %v2848_v58  ;;  %v4933_v42 = vpack.c.bf16 %v4746_v61, %v4730_v36 }
 0x4aa   : > { %v2868_v26 = vand.u32 4294901760, %v2867_v59 }
 0x4ab   : > { %2768 = vmatmul.mubr.f32.vlgmr.msra.gmra.mrb[16].mxu0 %v2767_v48  ;;  %v2862_v8 = vand.u32 4294901760, %v2861_v24 }
 0x4ac   : > { %3535 = vmatpush1.bf16.msra.mxu0 %v4748_v10  ;;  %v3546_v15 = vpack.c.bf16 %v2868_v26, %v2856_v32  ;;  %2918 = vmatprep.mubr.f32.mxu0 %v3968_v3  ;;  %v4932_v10 = vpack.c.bf16 %v4755_v41, %v4735_v60 }
 0x4ad   : > { %3537 = vmatprep.subr.bf16.mxu0 %v3536_v43  ;;  %v3544_v29 = vpack.c.bf16 %v2862_v8, %v2850_v12 }
 0x4b0   : > { %3539 = vmatpush1.bf16.msra.mxu0 %v4785_v62 }
 0x4b1   : > { %3541 = vmatprep.subr.bf16.mxu0 %v3540_v49 }
 0x4b4   : > { %3543 = vmatpush1.bf16.msra.mxu0 %v3542_v47 }
 0x4b5   : > { %3545 = vmatprep.subr.bf16.mxu0 %v3544_v29 }
 0x4b8   : > { %3547 = vmatpush1.bf16.msra.mxu0 %v3546_v15 }
 0x4b9   : > { %3549 = vmatprep.subr.bf16.mxu0 %v3548_v45 }
 0x4bb   : > { %2920 = vmatmul.mubr.f32.vlgmr.msra.gmra.mrb[16].mxu0 %v4717_v39 }
 0x4bc   : > { %3551 = vmatpush1.bf16.msra.mxu0 %v3550_v7  ;;  %3022 = vmatprep.mubr.f32.mxu0 %v3968_v3 }
 0x4bd   : > { %3553 = vmatprep.subr.bf16.mxu0 %v4932_v10 }
 0x4c0   : > { %3555 = vmatpush1.bf16.msra.mxu0 %v4933_v42 }
 0x4c1   : > { %3557 = vmatprep.subr.bf16.mxu0 %v3556_v50 }
 0x4c4   : > { %3559 = vmatpush1.bf16.msra.mxu0 %v4934_v9 }
 0x4c5   : > { %3561 = vmatprep.subr.bf16.mxu0 %v3560_v35 }
 0x4c8   : > { %3563 = vmatpush1.bf16.msra.mxu0 %v3562_v0 }
 0x4c9   : > { %3565 = vmatprep.subr.bf16.mxu0 %v4719_v51 }
 0x4cb   : > { %3025 = vmatmul.mubr.f32.vlgmr.msra.gmra.mrb[16].mxu0 %v4751_v54 }
 0x4cc   : > { %3567 = vmatpush1.bf16.msra.mxu0 %v4712_v25  ;;  %3111 = vmatprep.mubr.f32.mxu0 %v3968_v3 }
 0x4cd   : > { %3569 = vmatprep.subr.bf16.mxu0 %v4753_v27 }
 0x4d0   : > { %3571 = vmatpush1.bf16.msra.mxu0 %v4744_v4 }
 0x4d1   : > { %3573 = vmatprep.subr.bf16.mxu0 %v4787_v20 }
 0x4d4   : > { %3575 = vmatpush1.bf16.msra.mxu0 %v4781_v37 }
 0x4d5   : > { %3577 = vmatprep.subr.bf16.mxu0 %v4813_v44 }
 0x4d8   : > { %3579 = vmatpush1.bf16.msra.mxu0 %v4811_v19 }
 0x4d9   : > { %3581 = vmatprep.subr.bf16.mxu0 %v4738_v63 }
 0x4db   : > { %3115 = vmatmul.mubr.f32.vlgmr.msra.gmra.mrb[16].mxu0 %v4935_v1 }
 0x4dc   : > { %3583 = vmatpush1.bf16.msra.mxu0 %v4740_v5  ;;  %3233 = vmatprep.mubr.f32.mxu0 %v3968_v3 }
 0x4dd   : > { %3585 = vmatprep.subr.bf16.mxu0 %v4775_v34 }
 0x4e0   : > { %3587 = vmatpush1.bf16.msra.mxu0 %v4778_v6 }
 0x4e1   : > { %3589 = vmatprep.subr.bf16.mxu0 %v4809_v17 }
 0x4e4   : > { %3591 = vmatpush1.bf16.msra.mxu0 %v4803_v14 }
 0x4e5   : > { %3593 = vmatprep.subr.bf16.mxu0 %v3592_v52 }
 0x4e8   : > { %3595 = vmatpush1.bf16.msra.mxu0 %v3594_v21 }
 0x4e9   : > { %3597 = vmatprep.subr.bf16.mxu0 %v4719_v51 }
 0x4eb   : > { %3235 = vmatmul.mubr.f32.vlgmr.msra.gmra.mrb[16].mxu0 %v4717_v39 }
 0x4ec   : > { %3599 = vmatpush1.bf16.msra.mxu0 %v4712_v25  ;;  %3321 = vmatprep.mubr.f32.mxu0 %v3968_v3 }
 0x4ed   : > { %3601 = vmatprep.subr.bf16.mxu0 %v4753_v27 }
 0x4f0   : > { %3603 = vmatpush1.bf16.msra.mxu0 %v4744_v4 }
 0x4f1   : > { %3605 = vmatprep.subr.bf16.mxu0 %v4787_v20 }
 0x4f4   : > { %3607 = vmatpush1.bf16.msra.mxu0 %v4781_v37 }
 0x4f5   : > { %3609 = vmatprep.subr.bf16.mxu0 %v4813_v44 }
 0x4f8   : > { %3611 = vmatpush1.bf16.msra.mxu0 %v4811_v19 }
 0x4fb   : > { %3323 = vmatmul.mubr.f32.vlgmr.msra.gmra.mrb[16].mxu0 %v4717_v39 }
 0x5ce   : > { %v3324_v3 = vpop.f32.mrb[16].mxu0 }
 0x5cf   : > { %v3329_v25 = vadd.f32 %v4464_v38, %v3324_v3  ;;  %v3326_v23 = vpop.f32.mrb[17].mxu0 }
 0x5d0   : > { %v3330_v51 = vadd.f32 %v4466_v46, %v3326_v23 }
 0x5d1   : > { %3331 = vst [vmem:[%s245_s11] sm:$0xff] %v3329_v25 }
 0x5d2   : > { %3332 = vst [vmem:[%s245_s11 + $0x8] sm:$0xff] %v3330_v51 }
 0x5d3   : > { %3917 = shalt.err (!%p3914_p3)
}
 0x5d4   : > { %s3918_s19 = scalar_lea.hbm %s4875_s14, 256  ;;  %s3922_s28 = scalar_lea.hbm %s4923_s6, 1024 }
 0x5d5   : > { %p3919_p4 = scmp.ne.s32.totalorder %s4875_s14, %s3918_s19  ;;  %p3923_p9 = scmp.lt.u32.totalorder %s4875_s14, %s4923_s6 }
 0x5d6   : > { %p3924_p10 = scmp.lt.u32.totalorder %s3922_s28, %s3918_s19  ;;  %p3926_p12 = scmp.lt.u32.totalorder %s3918_s19, %s4875_s14 }
 0x5d7   : > { %p3920_p7 = pnand %p3919_p4, %p4044_p5 }
 0x5d8   : > { %p3925_p11 = por %p3924_p10, %p3923_p9 }
 0x5d9   : > { %p3921_p8 = pneg %p3920_p7 }
 0x5da   : > { %p3927_p13 = por %p3926_p12, %p3925_p11 }
 0x5dc   : > { %p3928_p0 = pnand %p3927_p13, %p3921_p8 }
 0x5de   : > { %3931 = shalt.err (!%p3928_p0)
}
 0x5df   : > { %3794 = dma.vmem_to_hbm [thread:$0]  (%p4044_p5), %s4877_s9, 256, %s4875_s14, %s3334_s25  }
 0x5e0 PF: > { %p3800_p1 = scmp.ge.s32.totalorder %s3966_s24, 2  ;;  %s3360_s11 = sand.u32 1, %s3954_s21  }
 0x5e1   : > { %s3361_s12 = scalar_lea.sflag [#allocation3], %s3360_s11 }
 0x5e2   : > { %p3797_p2 = pnand %p3800_p1, %p4048_p6 }
 0x5e4   : > { %3949 = dma.done.wait (!%p3797_p2), %s3361_s12, 256  }
 0x5e5   : > { %3951 = vsyncadd (!%p3797_p2), %s3361_s12, 4294967040  ;;  %p16_p3 = scmp.ge.s32.totalorder %s4031_s27, 6   ;;  %s4936_s21 = smov %s3958_s22 }
 0x5e6   : > { %s4937_s22 = smov %s3962_s23  ;;  %s4938_s23 = smov %s4042_s30 }
 0x5e7   : > { %s4939_s24 = smov %s4031_s27  ;;  %18 = sbr.rel (!%p16_p3) target bundleno = 3 (0x3), region = 79 }
 0x5ee   :  { %3366 = vsyncpa [#allocation3], 1 }
 0x5ef   :  { %3368 = vsyncpa [#allocation3 + $0x1], 1 }

</bundles_post_ra>
